<compile_context>
chip_gen: v6e
topology: v6e:2x2x1
jax: 0.10.0
libtpu: 0.0.40
codegen_flags: <defaults>
</compile_context>

<pallas_src>
import functools

import jax
import jax.numpy as jnp
from jax.experimental import pallas as pl
from jax.experimental.pallas import tpu as pltpu


_NTAP = 75   # 3 input channels x 5x5 footprint
_KP = 80     # tap rows padded to a multiple of 8; row 75 = constant-ones bias row
_CO = 16     # 12 real output channels padded to 16


def _inception_kernel(wmat_ref, xflat_ref, out_ref, t_ref, *, wp, p):
    """One grid step: a block of Nb images.

    wmat_ref : (16, 80)       packed weights (+bias column 75), VMEM
    xflat_ref: (Nb, 3, Fl)    flattened zero-padded images, VMEM
    out_ref  : (Nb, 16, P)    relu(concat of branches) in flattened-padded layout
    t_ref    : (80, Nb*P)     VMEM scratch tap matrix (shared by all Nb images)
    """
    nb = xflat_ref.shape[0]
    np_ = nb * p

    # Constant rows: ones bias row + zero padding rows.  Rewritten every step
    # (cheap) so per-core scratch is always valid under megacore sharding.
    t_ref[_NTAP, :] = jnp.ones((np_,), jnp.float32)
    t_ref[_NTAP + 1:, :] = jnp.zeros((_KP - _NTAP - 1, np_), jnp.float32)

    # Build the tap matrix: row (ci,dy,dx), columns [b*P, (b+1)*P) hold the
    # contiguous window of image b's flattened padded data starting at
    # offset dy*Wp+dx.  One slice per tap, dedup across all 12 output
    # channels; pool taps shared with the 3x3 footprint.
    for b in range(nb):
        col = b * p
        for ci in range(3):
            for dy in range(5):
                base = ci * 25 + dy * 5
                off0 = dy * wp
                for dx in range(5):
                    t_ref[base + dx, pl.ds(col, p)] = \
                        xflat_ref[b, ci, pl.ds(off0 + dx, p)]

    # All four branches + biases for the whole image block in a single MXU
    # matmul; result is lane-dense (Nb*P is a multiple of 128 when P is).
    acc = jnp.dot(wmat_ref[...], t_ref[...],
                  preferred_element_type=jnp.float32,
                  precision=jax.lax.Precision.HIGHEST)
    y = jnp.maximum(acc, 0.0)

    for b in range(nb):
        out_ref[b] = y[:, b * p:(b + 1) * p]


def _pick_wp(h, w):
    """Padded width >= w+4; make H*Wp a multiple of 128 if cheaply possible."""
    base = w + 4
    for cand in range(base, base + 17):
        if (h * cand) % 128 == 0:
            return cand
    return base


def _pick_nb(n):
    """Images per grid step: batch work but keep >= 2 grid steps (v7x has 2 TCs)."""
    target = max(1, min(8, n // 2))
    for nb in range(target, 0, -1):
        if n % nb == 0:
            return nb
    return 1


def _pack_weights(w1, b1, w3, b3, w5, b5):
    """Pack all branch weights + biases into a (16, 80) matrix."""
    wm = jnp.zeros((_CO, 3, 5, 5), jnp.float32)
    wm = wm.at[0:3, :, 2, 2].set(w1[:, :, 0, 0])        # 1x1 conv, pad 0
    wm = wm.at[3:6, :, 1:4, 1:4].set(w3)                # 3x3 conv, pad 1
    wm = wm.at[6:9, :, :, :].set(w5)                    # 5x5 conv, pad 2
    for i in range(3):                                  # 3x3 avg pool, pad 1
        wm = wm.at[9 + i, i, 1:4, 1:4].set(1.0 / 9.0)   # count_include_pad=True
    wflat = jnp.zeros((_CO, _KP), jnp.float32)
    wflat = wflat.at[:, :_NTAP].set(wm.reshape(_CO, _NTAP))
    bias = jnp.concatenate([b1, b3, b5,
                            jnp.zeros(3, jnp.float32),
                            jnp.zeros(_CO - 12, jnp.float32)])
    wflat = wflat.at[:, _NTAP].set(bias)                # bias folded into matmul
    return wflat


def naive_inception(x, w1, b1, w3, b3, w5, b5):
    """x: (N, 3, H, W) float32 -> (N, 12, H, W) float32."""
    n, c, h, w = x.shape
    assert c == 3
    wp = _pick_wp(h, w)          # padded width (stride of the flattened layout)
    p = h * wp                   # flattened spatial extent per tap row
    hp = h + 5                   # pad 2 top / 3 bottom (extra row keeps every
                                 # tap window in-bounds inside the VMEM block)
    fl = hp * wp

    xp = jnp.pad(x, ((0, 0), (0, 0), (2, 3), (2, wp - w - 2)))
    xflat = xp.reshape(n, c, fl)
    wmat = _pack_weights(w1, b1, w3, b3, w5, b5)

    nb = _pick_nb(n)
    grid = (n // nb,)

    kernel = functools.partial(_inception_kernel, wp=wp, p=p)
    grid_spec = pltpu.PrefetchScalarGridSpec(
        num_scalar_prefetch=0,
        grid=grid,
        in_specs=[
            pl.BlockSpec((_CO, _KP), lambda i: (0, 0)),      # packed weights
            pl.BlockSpec((nb, c, fl), lambda i: (i, 0, 0)),  # image block
        ],
        out_specs=pl.BlockSpec((nb, _CO, p), lambda i: (i, 0, 0)),
        scratch_shapes=[pltpu.VMEM((_KP, nb * p), jnp.float32)],
    )

    out_flat = pl.pallas_call(
        kernel,
        out_shape=jax.ShapeDtypeStruct((n, _CO, p), jnp.float32),
        grid_spec=grid_spec,
        compiler_params=pltpu.CompilerParams(
            dimension_semantics=("parallel",)),
    )(wmat, xflat)

    # Layout plumbing back to NCHW: drop padded channels / padded columns.
    return out_flat.reshape(n, _CO, h, wp)[:, :12, :, :w]


def reference(x, w1, b1, w3, b3, w5, b5):
    """Plain-JAX reference matching torch semantics."""
    def conv(x, wgt, b, pad):
        y = jax.lax.conv_general_dilated(
            x, wgt, window_strides=(1, 1), padding=[(pad, pad), (pad, pad)],
            dimension_numbers=('NCHW', 'OIHW', 'NCHW'),
            precision=jax.lax.Precision.HIGHEST)
        return y + b[None, :, None, None]

    y1 = conv(x, w1, b1, 0)
    y3 = conv(x, w3, b3, 1)
    y5 = conv(x, w5, b5, 2)
    s = jax.lax.reduce_window(
        x, 0.0, jax.lax.add, (1, 1, 3, 3), (1, 1, 1, 1),
        [(0, 0), (0, 0), (1, 1), (1, 1)])
    yp = s / 9.0  # count_include_pad=True
    return jnp.maximum(jnp.concatenate([y1, y3, y5, yp], axis=1), 0.0)


if __name__ == "__main__":
    key = jax.random.PRNGKey(0)
    ks = jax.random.split(key, 7)
    x = jax.random.normal(ks[0], (2, 3, 16, 16), jnp.float32)
    # Deterministic synthetic parameters (shapes match nn.Conv2d in __init__).
    w1 = jax.random.normal(ks[1], (3, 3, 1, 1), jnp.float32) * 0.5
    b1 = jax.random.normal(ks[2], (3,), jnp.float32) * 0.1
    w3 = jax.random.normal(ks[3], (3, 3, 3, 3), jnp.float32) * 0.2
    b3 = jax.random.normal(ks[4], (3,), jnp.float32) * 0.1
    w5 = jax.random.normal(ks[5], (3, 3, 5, 5), jnp.float32) * 0.1
    b5 = jax.random.normal(ks[6], (3,), jnp.float32) * 0.1

    out = jax.block_until_ready(naive_inception(x, w1, b1, w3, b3, w5, b5))
    ref = reference(x, w1, b1, w3, b3, w5, b5)

    assert out.shape == (2, 12, 16, 16), out.shape
    err = float(jnp.max(jnp.abs(out - ref)))
    if err > 5e-4:
        raise SystemExit(f"mismatch vs reference: max abs err = {err}")
    print("KERNEL_OK")
</pallas_src>

<mosaic_0001>
module attributes {stable_mosaic.version = 11 : i64} {
  func.func @_inception_kernel(%arg0: i32, %arg1: memref<16x80xf32, #tpu.memory_space<vmem>>, %arg2: memref<1x3x504xf32, #tpu.memory_space<vmem>>, %arg3: memref<1x16x384xf32, #tpu.memory_space<vmem>>, %arg4: memref<80x384xf32, #tpu.memory_space<vmem>>) attributes {dimension_semantics = [#tpu.dimension_semantics<parallel>], iteration_bounds = array<i64: 2>, scalar_prefetch = 0 : i64, scratch_operands = 1 : i64, tpu.core_type = #tpu.core_type<tc>, window_params = [{pipeline_mode = #tpu.pipeline_mode<synchronous>, transform_indices = @transform_0, window_bounds = array<i64: 16, 80>}, {transform_indices = @transform_1, window_bounds = array<i64: 1, 3, 504>}, {transform_indices = @transform_2, window_bounds = array<i64: 1, 16, 384>}]} {
    %cst = arith.constant 1.000000e+00 : f32
    %0 = vector.broadcast %cst : f32 to vector<384xf32>
    %c75 = arith.constant 75 : index
    %c0 = arith.constant 0 : index
    %1 = vector.load %arg4[%c75, %c0] : memref<80x384xf32, #tpu.memory_space<vmem>>, vector<1x384xf32>
    %2 = vector.shape_cast %1 : vector<1x384xf32> to vector<384xf32>
    %3 = vector.shape_cast %0 : vector<384xf32> to vector<1x384xf32>
    tpu.vector_store %arg4[%c75, %c0], %3 {strides = array<i32>} : memref<80x384xf32, #tpu.memory_space<vmem>>, vector<1x384xf32>,
    %cst_0 = arith.constant 0.000000e+00 : f32
    %4 = vector.broadcast %cst_0 : f32 to vector<4x384xf32>
    %c76 = arith.constant 76 : index
    %c0_1 = arith.constant 0 : index
    %5 = vector.load %arg4[%c76, %c0_1] : memref<80x384xf32, #tpu.memory_space<vmem>>, vector<4x384xf32>
    tpu.vector_store %arg4[%c76, %c0_1], %4 {strides = array<i32>} : memref<80x384xf32, #tpu.memory_space<vmem>>, vector<4x384xf32>,
    %c0_2 = arith.constant 0 : index
    %c0_3 = arith.constant 0 : index
    %c0_4 = arith.constant 0 : index
    %6 = vector.load %arg2[%c0_2, %c0_3, %c0_4] : memref<1x3x504xf32, #tpu.memory_space<vmem>>, vector<1x1x384xf32>
    %7 = vector.shape_cast %6 : vector<1x1x384xf32> to vector<384xf32>
    %c0_5 = arith.constant 0 : index
    %c0_6 = arith.constant 0 : index
    %8 = vector.load %arg4[%c0_5, %c0_6] : memref<80x384xf32, #tpu.memory_space<vmem>>, vector<1x384xf32>
    %9 = vector.shape_cast %8 : vector<1x384xf32> to vector<384xf32>
    %10 = vector.shape_cast %7 : vector<384xf32> to vector<1x384xf32>
    tpu.vector_store %arg4[%c0_5, %c0_6], %10 {strides = array<i32>} : memref<80x384xf32, #tpu.memory_space<vmem>>, vector<1x384xf32>,
    %c0_7 = arith.constant 0 : index
    %c0_8 = arith.constant 0 : index
    %c1 = arith.constant 1 : index
    %11 = vector.load %arg2[%c0_7, %c0_8, %c1] : memref<1x3x504xf32, #tpu.memory_space<vmem>>, vector<1x1x384xf32>
    %12 = vector.shape_cast %11 : vector<1x1x384xf32> to vector<384xf32>
    %c1_9 = arith.constant 1 : index
    %c0_10 = arith.constant 0 : index
    %13 = vector.load %arg4[%c1_9, %c0_10] : memref<80x384xf32, #tpu.memory_space<vmem>>, vector<1x384xf32>
    %14 = vector.shape_cast %13 : vector<1x384xf32> to vector<384xf32>
    %15 = vector.shape_cast %12 : vector<384xf32> to vector<1x384xf32>
    tpu.vector_store %arg4[%c1_9, %c0_10], %15 {strides = array<i32>} : memref<80x384xf32, #tpu.memory_space<vmem>>, vector<1x384xf32>,
    %c0_11 = arith.constant 0 : index
    %c0_12 = arith.constant 0 : index
    %c2 = arith.constant 2 : index
    %16 = vector.load %arg2[%c0_11, %c0_12, %c2] : memref<1x3x504xf32, #tpu.memory_space<vmem>>, vector<1x1x384xf32>
    %17 = vector.shape_cast %16 : vector<1x1x384xf32> to vector<384xf32>
    %c2_13 = arith.constant 2 : index
    %c0_14 = arith.constant 0 : index
    %18 = vector.load %arg4[%c2_13, %c0_14] : memref<80x384xf32, #tpu.memory_space<vmem>>, vector<1x384xf32>
    %19 = vector.shape_cast %18 : vector<1x384xf32> to vector<384xf32>
    %20 = vector.shape_cast %17 : vector<384xf32> to vector<1x384xf32>
    tpu.vector_store %arg4[%c2_13, %c0_14], %20 {strides = array<i32>} : memref<80x384xf32, #tpu.memory_space<vmem>>, vector<1x384xf32>,
    %c0_15 = arith.constant 0 : index
    %c0_16 = arith.constant 0 : index
    %c3 = arith.constant 3 : index
    %21 = vector.load %arg2[%c0_15, %c0_16, %c3] : memref<1x3x504xf32, #tpu.memory_space<vmem>>, vector<1x1x384xf32>
    %22 = vector.shape_cast %21 : vector<1x1x384xf32> to vector<384xf32>
    %c3_17 = arith.constant 3 : index
    %c0_18 = arith.constant 0 : index
    %23 = vector.load %arg4[%c3_17, %c0_18] : memref<80x384xf32, #tpu.memory_space<vmem>>, vector<1x384xf32>
    %24 = vector.shape_cast %23 : vector<1x384xf32> to vector<384xf32>
    %25 = vector.shape_cast %22 : vector<384xf32> to vector<1x384xf32>
    tpu.vector_store %arg4[%c3_17, %c0_18], %25 {strides = array<i32>} : memref<80x384xf32, #tpu.memory_space<vmem>>, vector<1x384xf32>,
    %c0_19 = arith.constant 0 : index
    %c0_20 = arith.constant 0 : index
    %c4 = arith.constant 4 : index
    %26 = vector.load %arg2[%c0_19, %c0_20, %c4] : memref<1x3x504xf32, #tpu.memory_space<vmem>>, vector<1x1x384xf32>
    %27 = vector.shape_cast %26 : vector<1x1x384xf32> to vector<384xf32>
    %c4_21 = arith.constant 4 : index
    %c0_22 = arith.constant 0 : index
    %28 = vector.load %arg4[%c4_21, %c0_22] : memref<80x384xf32, #tpu.memory_space<vmem>>, vector<1x384xf32>
    %29 = vector.shape_cast %28 : vector<1x384xf32> to vector<384xf32>
    %30 = vector.shape_cast %27 : vector<384xf32> to vector<1x384xf32>
    tpu.vector_store %arg4[%c4_21, %c0_22], %30 {strides = array<i32>} : memref<80x384xf32, #tpu.memory_space<vmem>>, vector<1x384xf32>,
    %c0_23 = arith.constant 0 : index
    %c0_24 = arith.constant 0 : index
    %c24 = arith.constant 24 : index
    %31 = vector.load %arg2[%c0_23, %c0_24, %c24] : memref<1x3x504xf32, #tpu.memory_space<vmem>>, vector<1x1x384xf32>
    %32 = vector.shape_cast %31 : vector<1x1x384xf32> to vector<384xf32>
    %c5 = arith.constant 5 : index
    %c0_25 = arith.constant 0 : index
    %33 = vector.load %arg4[%c5, %c0_25] : memref<80x384xf32, #tpu.memory_space<vmem>>, vector<1x384xf32>
    %34 = vector.shape_cast %33 : vector<1x384xf32> to vector<384xf32>
    %35 = vector.shape_cast %32 : vector<384xf32> to vector<1x384xf32>
    tpu.vector_store %arg4[%c5, %c0_25], %35 {strides = array<i32>} : memref<80x384xf32, #tpu.memory_space<vmem>>, vector<1x384xf32>,
    %c0_26 = arith.constant 0 : index
    %c0_27 = arith.constant 0 : index
    %c25 = arith.constant 25 : index
    %36 = vector.load %arg2[%c0_26, %c0_27, %c25] : memref<1x3x504xf32, #tpu.memory_space<vmem>>, vector<1x1x384xf32>
    %37 = vector.shape_cast %36 : vector<1x1x384xf32> to vector<384xf32>
    %c6 = arith.constant 6 : index
    %c0_28 = arith.constant 0 : index
    %38 = vector.load %arg4[%c6, %c0_28] : memref<80x384xf32, #tpu.memory_space<vmem>>, vector<1x384xf32>
    %39 = vector.shape_cast %38 : vector<1x384xf32> to vector<384xf32>
    %40 = vector.shape_cast %37 : vector<384xf32> to vector<1x384xf32>
    tpu.vector_store %arg4[%c6, %c0_28], %40 {strides = array<i32>} : memref<80x384xf32, #tpu.memory_space<vmem>>, vector<1x384xf32>,
    %c0_29 = arith.constant 0 : index
    %c0_30 = arith.constant 0 : index
    %c26 = arith.constant 26 : index
    %41 = vector.load %arg2[%c0_29, %c0_30, %c26] : memref<1x3x504xf32, #tpu.memory_space<vmem>>, vector<1x1x384xf32>
    %42 = vector.shape_cast %41 : vector<1x1x384xf32> to vector<384xf32>
    %c7 = arith.constant 7 : index
    %c0_31 = arith.constant 0 : index
    %43 = vector.load %arg4[%c7, %c0_31] : memref<80x384xf32, #tpu.memory_space<vmem>>, vector<1x384xf32>
    %44 = vector.shape_cast %43 : vector<1x384xf32> to vector<384xf32>
    %45 = vector.shape_cast %42 : vector<384xf32> to vector<1x384xf32>
    tpu.vector_store %arg4[%c7, %c0_31], %45 {strides = array<i32>} : memref<80x384xf32, #tpu.memory_space<vmem>>, vector<1x384xf32>,
    %c0_32 = arith.constant 0 : index
    %c0_33 = arith.constant 0 : index
    %c27 = arith.constant 27 : index
    %46 = vector.load %arg2[%c0_32, %c0_33, %c27] : memref<1x3x504xf32, #tpu.memory_space<vmem>>, vector<1x1x384xf32>
    %47 = vector.shape_cast %46 : vector<1x1x384xf32> to vector<384xf32>
    %c8 = arith.constant 8 : index
    %c0_34 = arith.constant 0 : index
    %48 = vector.load %arg4[%c8, %c0_34] : memref<80x384xf32, #tpu.memory_space<vmem>>, vector<1x384xf32>
    %49 = vector.shape_cast %48 : vector<1x384xf32> to vector<384xf32>
    %50 = vector.shape_cast %47 : vector<384xf32> to vector<1x384xf32>
    tpu.vector_store %arg4[%c8, %c0_34], %50 {strides = array<i32>} : memref<80x384xf32, #tpu.memory_space<vmem>>, vector<1x384xf32>,
    %c0_35 = arith.constant 0 : index
    %c0_36 = arith.constant 0 : index
    %c28 = arith.constant 28 : index
    %51 = vector.load %arg2[%c0_35, %c0_36, %c28] : memref<1x3x504xf32, #tpu.memory_space<vmem>>, vector<1x1x384xf32>
    %52 = vector.shape_cast %51 : vector<1x1x384xf32> to vector<384xf32>
    %c9 = arith.constant 9 : index
    %c0_37 = arith.constant 0 : index
    %53 = vector.load %arg4[%c9, %c0_37] : memref<80x384xf32, #tpu.memory_space<vmem>>, vector<1x384xf32>
    %54 = vector.shape_cast %53 : vector<1x384xf32> to vector<384xf32>
    %55 = vector.shape_cast %52 : vector<384xf32> to vector<1x384xf32>
    tpu.vector_store %arg4[%c9, %c0_37], %55 {strides = array<i32>} : memref<80x384xf32, #tpu.memory_space<vmem>>, vector<1x384xf32>,
    %c0_38 = arith.constant 0 : index
    %c0_39 = arith.constant 0 : index
    %c48 = arith.constant 48 : index
    %56 = vector.load %arg2[%c0_38, %c0_39, %c48] : memref<1x3x504xf32, #tpu.memory_space<vmem>>, vector<1x1x384xf32>
    %57 = vector.shape_cast %56 : vector<1x1x384xf32> to vector<384xf32>
    %c10 = arith.constant 10 : index
    %c0_40 = arith.constant 0 : index
    %58 = vector.load %arg4[%c10, %c0_40] : memref<80x384xf32, #tpu.memory_space<vmem>>, vector<1x384xf32>
    %59 = vector.shape_cast %58 : vector<1x384xf32> to vector<384xf32>
    %60 = vector.shape_cast %57 : vector<384xf32> to vector<1x384xf32>
    tpu.vector_store %arg4[%c10, %c0_40], %60 {strides = array<i32>} : memref<80x384xf32, #tpu.memory_space<vmem>>, vector<1x384xf32>,
    %c0_41 = arith.constant 0 : index
    %c0_42 = arith.constant 0 : index
    %c49 = arith.constant 49 : index
    %61 = vector.load %arg2[%c0_41, %c0_42, %c49] : memref<1x3x504xf32, #tpu.memory_space<vmem>>, vector<1x1x384xf32>
    %62 = vector.shape_cast %61 : vector<1x1x384xf32> to vector<384xf32>
    %c11 = arith.constant 11 : index
    %c0_43 = arith.constant 0 : index
    %63 = vector.load %arg4[%c11, %c0_43] : memref<80x384xf32, #tpu.memory_space<vmem>>, vector<1x384xf32>
    %64 = vector.shape_cast %63 : vector<1x384xf32> to vector<384xf32>
    %65 = vector.shape_cast %62 : vector<384xf32> to vector<1x384xf32>
    tpu.vector_store %arg4[%c11, %c0_43], %65 {strides = array<i32>} : memref<80x384xf32, #tpu.memory_space<vmem>>, vector<1x384xf32>,
    %c0_44 = arith.constant 0 : index
    %c0_45 = arith.constant 0 : index
    %c50 = arith.constant 50 : index
    %66 = vector.load %arg2[%c0_44, %c0_45, %c50] : memref<1x3x504xf32, #tpu.memory_space<vmem>>, vector<1x1x384xf32>
    %67 = vector.shape_cast %66 : vector<1x1x384xf32> to vector<384xf32>
    %c12 = arith.constant 12 : index
    %c0_46 = arith.constant 0 : index
    %68 = vector.load %arg4[%c12, %c0_46] : memref<80x384xf32, #tpu.memory_space<vmem>>, vector<1x384xf32>
    %69 = vector.shape_cast %68 : vector<1x384xf32> to vector<384xf32>
    %70 = vector.shape_cast %67 : vector<384xf32> to vector<1x384xf32>
    tpu.vector_store %arg4[%c12, %c0_46], %70 {strides = array<i32>} : memref<80x384xf32, #tpu.memory_space<vmem>>, vector<1x384xf32>,
    %c0_47 = arith.constant 0 : index
    %c0_48 = arith.constant 0 : index
    %c51 = arith.constant 51 : index
    %71 = vector.load %arg2[%c0_47, %c0_48, %c51] : memref<1x3x504xf32, #tpu.memory_space<vmem>>, vector<1x1x384xf32>
    %72 = vector.shape_cast %71 : vector<1x1x384xf32> to vector<384xf32>
    %c13 = arith.constant 13 : index
    %c0_49 = arith.constant 0 : index
    %73 = vector.load %arg4[%c13, %c0_49] : memref<80x384xf32, #tpu.memory_space<vmem>>, vector<1x384xf32>
    %74 = vector.shape_cast %73 : vector<1x384xf32> to vector<384xf32>
    %75 = vector.shape_cast %72 : vector<384xf32> to vector<1x384xf32>
    tpu.vector_store %arg4[%c13, %c0_49], %75 {strides = array<i32>} : memref<80x384xf32, #tpu.memory_space<vmem>>, vector<1x384xf32>,
    %c0_50 = arith.constant 0 : index
    %c0_51 = arith.constant 0 : index
    %c52 = arith.constant 52 : index
    %76 = vector.load %arg2[%c0_50, %c0_51, %c52] : memref<1x3x504xf32, #tpu.memory_space<vmem>>, vector<1x1x384xf32>
    %77 = vector.shape_cast %76 : vector<1x1x384xf32> to vector<384xf32>
    %c14 = arith.constant 14 : index
    %c0_52 = arith.constant 0 : index
    %78 = vector.load %arg4[%c14, %c0_52] : memref<80x384xf32, #tpu.memory_space<vmem>>, vector<1x384xf32>
    %79 = vector.shape_cast %78 : vector<1x384xf32> to vector<384xf32>
    %80 = vector.shape_cast %77 : vector<384xf32> to vector<1x384xf32>
    tpu.vector_store %arg4[%c14, %c0_52], %80 {strides = array<i32>} : memref<80x384xf32, #tpu.memory_space<vmem>>, vector<1x384xf32>,
    %c0_53 = arith.constant 0 : index
    %c0_54 = arith.constant 0 : index
    %c72 = arith.constant 72 : index
    %81 = vector.load %arg2[%c0_53, %c0_54, %c72] : memref<1x3x504xf32, #tpu.memory_space<vmem>>, vector<1x1x384xf32>
    %82 = vector.shape_cast %81 : vector<1x1x384xf32> to vector<384xf32>
    %c15 = arith.constant 15 : index
    %c0_55 = arith.constant 0 : index
    %83 = vector.load %arg4[%c15, %c0_55] : memref<80x384xf32, #tpu.memory_space<vmem>>, vector<1x384xf32>
    %84 = vector.shape_cast %83 : vector<1x384xf32> to vector<384xf32>
    %85 = vector.shape_cast %82 : vector<384xf32> to vector<1x384xf32>
    tpu.vector_store %arg4[%c15, %c0_55], %85 {strides = array<i32>} : memref<80x384xf32, #tpu.memory_space<vmem>>, vector<1x384xf32>,
    %c0_56 = arith.constant 0 : index
    %c0_57 = arith.constant 0 : index
    %c73 = arith.constant 73 : index
    %86 = vector.load %arg2[%c0_56, %c0_57, %c73] : memref<1x3x504xf32, #tpu.memory_space<vmem>>, vector<1x1x384xf32>
    %87 = vector.shape_cast %86 : vector<1x1x384xf32> to vector<384xf32>
    %c16 = arith.constant 16 : index
    %c0_58 = arith.constant 0 : index
    %88 = vector.load %arg4[%c16, %c0_58] : memref<80x384xf32, #tpu.memory_space<vmem>>, vector<1x384xf32>
    %89 = vector.shape_cast %88 : vector<1x384xf32> to vector<384xf32>
    %90 = vector.shape_cast %87 : vector<384xf32> to vector<1x384xf32>
    tpu.vector_store %arg4[%c16, %c0_58], %90 {strides = array<i32>} : memref<80x384xf32, #tpu.memory_space<vmem>>, vector<1x384xf32>,
    %c0_59 = arith.constant 0 : index
    %c0_60 = arith.constant 0 : index
    %c74 = arith.constant 74 : index
    %91 = vector.load %arg2[%c0_59, %c0_60, %c74] : memref<1x3x504xf32, #tpu.memory_space<vmem>>, vector<1x1x384xf32>
    %92 = vector.shape_cast %91 : vector<1x1x384xf32> to vector<384xf32>
    %c17 = arith.constant 17 : index
    %c0_61 = arith.constant 0 : index
    %93 = vector.load %arg4[%c17, %c0_61] : memref<80x384xf32, #tpu.memory_space<vmem>>, vector<1x384xf32>
    %94 = vector.shape_cast %93 : vector<1x384xf32> to vector<384xf32>
    %95 = vector.shape_cast %92 : vector<384xf32> to vector<1x384xf32>
    tpu.vector_store %arg4[%c17, %c0_61], %95 {strides = array<i32>} : memref<80x384xf32, #tpu.memory_space<vmem>>, vector<1x384xf32>,
    %c0_62 = arith.constant 0 : index
    %c0_63 = arith.constant 0 : index
    %c75_64 = arith.constant 75 : index
    %96 = vector.load %arg2[%c0_62, %c0_63, %c75_64] : memref<1x3x504xf32, #tpu.memory_space<vmem>>, vector<1x1x384xf32>
    %97 = vector.shape_cast %96 : vector<1x1x384xf32> to vector<384xf32>
    %c18 = arith.constant 18 : index
    %c0_65 = arith.constant 0 : index
    %98 = vector.load %arg4[%c18, %c0_65] : memref<80x384xf32, #tpu.memory_space<vmem>>, vector<1x384xf32>
    %99 = vector.shape_cast %98 : vector<1x384xf32> to vector<384xf32>
    %100 = vector.shape_cast %97 : vector<384xf32> to vector<1x384xf32>
    tpu.vector_store %arg4[%c18, %c0_65], %100 {strides = array<i32>} : memref<80x384xf32, #tpu.memory_space<vmem>>, vector<1x384xf32>,
    %c0_66 = arith.constant 0 : index
    %c0_67 = arith.constant 0 : index
    %c76_68 = arith.constant 76 : index
    %101 = vector.load %arg2[%c0_66, %c0_67, %c76_68] : memref<1x3x504xf32, #tpu.memory_space<vmem>>, vector<1x1x384xf32>
    %102 = vector.shape_cast %101 : vector<1x1x384xf32> to vector<384xf32>
    %c19 = arith.constant 19 : index
    %c0_69 = arith.constant 0 : index
    %103 = vector.load %arg4[%c19, %c0_69] : memref<80x384xf32, #tpu.memory_space<vmem>>, vector<1x384xf32>
    %104 = vector.shape_cast %103 : vector<1x384xf32> to vector<384xf32>
    %105 = vector.shape_cast %102 : vector<384xf32> to vector<1x384xf32>
    tpu.vector_store %arg4[%c19, %c0_69], %105 {strides = array<i32>} : memref<80x384xf32, #tpu.memory_space<vmem>>, vector<1x384xf32>,
    %c0_70 = arith.constant 0 : index
    %c0_71 = arith.constant 0 : index
    %c96 = arith.constant 96 : index
    %106 = vector.load %arg2[%c0_70, %c0_71, %c96] : memref<1x3x504xf32, #tpu.memory_space<vmem>>, vector<1x1x384xf32>
    %107 = vector.shape_cast %106 : vector<1x1x384xf32> to vector<384xf32>
    %c20 = arith.constant 20 : index
    %c0_72 = arith.constant 0 : index
    %108 = vector.load %arg4[%c20, %c0_72] : memref<80x384xf32, #tpu.memory_space<vmem>>, vector<1x384xf32>
    %109 = vector.shape_cast %108 : vector<1x384xf32> to vector<384xf32>
    %110 = vector.shape_cast %107 : vector<384xf32> to vector<1x384xf32>
    tpu.vector_store %arg4[%c20, %c0_72], %110 {strides = array<i32>} : memref<80x384xf32, #tpu.memory_space<vmem>>, vector<1x384xf32>,
    %c0_73 = arith.constant 0 : index
    %c0_74 = arith.constant 0 : index
    %c97 = arith.constant 97 : index
    %111 = vector.load %arg2[%c0_73, %c0_74, %c97] : memref<1x3x504xf32, #tpu.memory_space<vmem>>, vector<1x1x384xf32>
    %112 = vector.shape_cast %111 : vector<1x1x384xf32> to vector<384xf32>
    %c21 = arith.constant 21 : index
    %c0_75 = arith.constant 0 : index
    %113 = vector.load %arg4[%c21, %c0_75] : memref<80x384xf32, #tpu.memory_space<vmem>>, vector<1x384xf32>
    %114 = vector.shape_cast %113 : vector<1x384xf32> to vector<384xf32>
    %115 = vector.shape_cast %112 : vector<384xf32> to vector<1x384xf32>
    tpu.vector_store %arg4[%c21, %c0_75], %115 {strides = array<i32>} : memref<80x384xf32, #tpu.memory_space<vmem>>, vector<1x384xf32>,
    %c0_76 = arith.constant 0 : index
    %c0_77 = arith.constant 0 : index
    %c98 = arith.constant 98 : index
    %116 = vector.load %arg2[%c0_76, %c0_77, %c98] : memref<1x3x504xf32, #tpu.memory_space<vmem>>, vector<1x1x384xf32>
    %117 = vector.shape_cast %116 : vector<1x1x384xf32> to vector<384xf32>
    %c22 = arith.constant 22 : index
    %c0_78 = arith.constant 0 : index
    %118 = vector.load %arg4[%c22, %c0_78] : memref<80x384xf32, #tpu.memory_space<vmem>>, vector<1x384xf32>
    %119 = vector.shape_cast %118 : vector<1x384xf32> to vector<384xf32>
    %120 = vector.shape_cast %117 : vector<384xf32> to vector<1x384xf32>
    tpu.vector_store %arg4[%c22, %c0_78], %120 {strides = array<i32>} : memref<80x384xf32, #tpu.memory_space<vmem>>, vector<1x384xf32>,
    %c0_79 = arith.constant 0 : index
    %c0_80 = arith.constant 0 : index
    %c99 = arith.constant 99 : index
    %121 = vector.load %arg2[%c0_79, %c0_80, %c99] : memref<1x3x504xf32, #tpu.memory_space<vmem>>, vector<1x1x384xf32>
    %122 = vector.shape_cast %121 : vector<1x1x384xf32> to vector<384xf32>
    %c23 = arith.constant 23 : index
    %c0_81 = arith.constant 0 : index
    %123 = vector.load %arg4[%c23, %c0_81] : memref<80x384xf32, #tpu.memory_space<vmem>>, vector<1x384xf32>
    %124 = vector.shape_cast %123 : vector<1x384xf32> to vector<384xf32>
    %125 = vector.shape_cast %122 : vector<384xf32> to vector<1x384xf32>
    tpu.vector_store %arg4[%c23, %c0_81], %125 {strides = array<i32>} : memref<80x384xf32, #tpu.memory_space<vmem>>, vector<1x384xf32>,
    %c0_82 = arith.constant 0 : index
    %c0_83 = arith.constant 0 : index
    %c100 = arith.constant 100 : index
    %126 = vector.load %arg2[%c0_82, %c0_83, %c100] : memref<1x3x504xf32, #tpu.memory_space<vmem>>, vector<1x1x384xf32>
    %127 = vector.shape_cast %126 : vector<1x1x384xf32> to vector<384xf32>
    %c24_84 = arith.constant 24 : index
    %c0_85 = arith.constant 0 : index
    %128 = vector.load %arg4[%c24_84, %c0_85] : memref<80x384xf32, #tpu.memory_space<vmem>>, vector<1x384xf32>
    %129 = vector.shape_cast %128 : vector<1x384xf32> to vector<384xf32>
    %130 = vector.shape_cast %127 : vector<384xf32> to vector<1x384xf32>
    tpu.vector_store %arg4[%c24_84, %c0_85], %130 {strides = array<i32>} : memref<80x384xf32, #tpu.memory_space<vmem>>, vector<1x384xf32>,
    %c0_86 = arith.constant 0 : index
    %c1_87 = arith.constant 1 : index
    %c0_88 = arith.constant 0 : index
    %131 = vector.load %arg2[%c0_86, %c1_87, %c0_88] : memref<1x3x504xf32, #tpu.memory_space<vmem>>, vector<1x1x384xf32>
    %132 = vector.shape_cast %131 : vector<1x1x384xf32> to vector<384xf32>
    %c25_89 = arith.constant 25 : index
    %c0_90 = arith.constant 0 : index
    %133 = vector.load %arg4[%c25_89, %c0_90] : memref<80x384xf32, #tpu.memory_space<vmem>>, vector<1x384xf32>
    %134 = vector.shape_cast %133 : vector<1x384xf32> to vector<384xf32>
    %135 = vector.shape_cast %132 : vector<384xf32> to vector<1x384xf32>
    tpu.vector_store %arg4[%c25_89, %c0_90], %135 {strides = array<i32>} : memref<80x384xf32, #tpu.memory_space<vmem>>, vector<1x384xf32>,
    %c0_91 = arith.constant 0 : index
    %c1_92 = arith.constant 1 : index
    %c1_93 = arith.constant 1 : index
    %136 = vector.load %arg2[%c0_91, %c1_92, %c1_93] : memref<1x3x504xf32, #tpu.memory_space<vmem>>, vector<1x1x384xf32>
    %137 = vector.shape_cast %136 : vector<1x1x384xf32> to vector<384xf32>
    %c26_94 = arith.constant 26 : index
    %c0_95 = arith.constant 0 : index
    %138 = vector.load %arg4[%c26_94, %c0_95] : memref<80x384xf32, #tpu.memory_space<vmem>>, vector<1x384xf32>
    %139 = vector.shape_cast %138 : vector<1x384xf32> to vector<384xf32>
    %140 = vector.shape_cast %137 : vector<384xf32> to vector<1x384xf32>
    tpu.vector_store %arg4[%c26_94, %c0_95], %140 {strides = array<i32>} : memref<80x384xf32, #tpu.memory_space<vmem>>, vector<1x384xf32>,
    %c0_96 = arith.constant 0 : index
    %c1_97 = arith.constant 1 : index
    %c2_98 = arith.constant 2 : index
    %141 = vector.load %arg2[%c0_96, %c1_97, %c2_98] : memref<1x3x504xf32, #tpu.memory_space<vmem>>, vector<1x1x384xf32>
    %142 = vector.shape_cast %141 : vector<1x1x384xf32> to vector<384xf32>
    %c27_99 = arith.constant 27 : index
    %c0_100 = arith.constant 0 : index
    %143 = vector.load %arg4[%c27_99, %c0_100] : memref<80x384xf32, #tpu.memory_space<vmem>>, vector<1x384xf32>
    %144 = vector.shape_cast %143 : vector<1x384xf32> to vector<384xf32>
    %145 = vector.shape_cast %142 : vector<384xf32> to vector<1x384xf32>
    tpu.vector_store %arg4[%c27_99, %c0_100], %145 {strides = array<i32>} : memref<80x384xf32, #tpu.memory_space<vmem>>, vector<1x384xf32>,
    %c0_101 = arith.constant 0 : index
    %c1_102 = arith.constant 1 : index
    %c3_103 = arith.constant 3 : index
    %146 = vector.load %arg2[%c0_101, %c1_102, %c3_103] : memref<1x3x504xf32, #tpu.memory_space<vmem>>, vector<1x1x384xf32>
    %147 = vector.shape_cast %146 : vector<1x1x384xf32> to vector<384xf32>
    %c28_104 = arith.constant 28 : index
    %c0_105 = arith.constant 0 : index
    %148 = vector.load %arg4[%c28_104, %c0_105] : memref<80x384xf32, #tpu.memory_space<vmem>>, vector<1x384xf32>
    %149 = vector.shape_cast %148 : vector<1x384xf32> to vector<384xf32>
    %150 = vector.shape_cast %147 : vector<384xf32> to vector<1x384xf32>
    tpu.vector_store %arg4[%c28_104, %c0_105], %150 {strides = array<i32>} : memref<80x384xf32, #tpu.memory_space<vmem>>, vector<1x384xf32>,
    %c0_106 = arith.constant 0 : index
    %c1_107 = arith.constant 1 : index
    %c4_108 = arith.constant 4 : index
    %151 = vector.load %arg2[%c0_106, %c1_107, %c4_108] : memref<1x3x504xf32, #tpu.memory_space<vmem>>, vector<1x1x384xf32>
    %152 = vector.shape_cast %151 : vector<1x1x384xf32> to vector<384xf32>
    %c29 = arith.constant 29 : index
    %c0_109 = arith.constant 0 : index
    %153 = vector.load %arg4[%c29, %c0_109] : memref<80x384xf32, #tpu.memory_space<vmem>>, vector<1x384xf32>
    %154 = vector.shape_cast %153 : vector<1x384xf32> to vector<384xf32>
    %155 = vector.shape_cast %152 : vector<384xf32> to vector<1x384xf32>
    tpu.vector_store %arg4[%c29, %c0_109], %155 {strides = array<i32>} : memref<80x384xf32, #tpu.memory_space<vmem>>, vector<1x384xf32>,
    %c0_110 = arith.constant 0 : index
    %c1_111 = arith.constant 1 : index
    %c24_112 = arith.constant 24 : index
    %156 = vector.load %arg2[%c0_110, %c1_111, %c24_112] : memref<1x3x504xf32, #tpu.memory_space<vmem>>, vector<1x1x384xf32>
    %157 = vector.shape_cast %156 : vector<1x1x384xf32> to vector<384xf32>
    %c30 = arith.constant 30 : index
    %c0_113 = arith.constant 0 : index
    %158 = vector.load %arg4[%c30, %c0_113] : memref<80x384xf32, #tpu.memory_space<vmem>>, vector<1x384xf32>
    %159 = vector.shape_cast %158 : vector<1x384xf32> to vector<384xf32>
    %160 = vector.shape_cast %157 : vector<384xf32> to vector<1x384xf32>
    tpu.vector_store %arg4[%c30, %c0_113], %160 {strides = array<i32>} : memref<80x384xf32, #tpu.memory_space<vmem>>, vector<1x384xf32>,
    %c0_114 = arith.constant 0 : index
    %c1_115 = arith.constant 1 : index
    %c25_116 = arith.constant 25 : index
    %161 = vector.load %arg2[%c0_114, %c1_115, %c25_116] : memref<1x3x504xf32, #tpu.memory_space<vmem>>, vector<1x1x384xf32>
    %162 = vector.shape_cast %161 : vector<1x1x384xf32> to vector<384xf32>
    %c31 = arith.constant 31 : index
    %c0_117 = arith.constant 0 : index
    %163 = vector.load %arg4[%c31, %c0_117] : memref<80x384xf32, #tpu.memory_space<vmem>>, vector<1x384xf32>
    %164 = vector.shape_cast %163 : vector<1x384xf32> to vector<384xf32>
    %165 = vector.shape_cast %162 : vector<384xf32> to vector<1x384xf32>
    tpu.vector_store %arg4[%c31, %c0_117], %165 {strides = array<i32>} : memref<80x384xf32, #tpu.memory_space<vmem>>, vector<1x384xf32>,
    %c0_118 = arith.constant 0 : index
    %c1_119 = arith.constant 1 : index
    %c26_120 = arith.constant 26 : index
    %166 = vector.load %arg2[%c0_118, %c1_119, %c26_120] : memref<1x3x504xf32, #tpu.memory_space<vmem>>, vector<1x1x384xf32>
    %167 = vector.shape_cast %166 : vector<1x1x384xf32> to vector<384xf32>
    %c32 = arith.constant 32 : index
    %c0_121 = arith.constant 0 : index
    %168 = vector.load %arg4[%c32, %c0_121] : memref<80x384xf32, #tpu.memory_space<vmem>>, vector<1x384xf32>
    %169 = vector.shape_cast %168 : vector<1x384xf32> to vector<384xf32>
    %170 = vector.shape_cast %167 : vector<384xf32> to vector<1x384xf32>
    tpu.vector_store %arg4[%c32, %c0_121], %170 {strides = array<i32>} : memref<80x384xf32, #tpu.memory_space<vmem>>, vector<1x384xf32>,
    %c0_122 = arith.constant 0 : index
    %c1_123 = arith.constant 1 : index
    %c27_124 = arith.constant 27 : index
    %171 = vector.load %arg2[%c0_122, %c1_123, %c27_124] : memref<1x3x504xf32, #tpu.memory_space<vmem>>, vector<1x1x384xf32>
    %172 = vector.shape_cast %171 : vector<1x1x384xf32> to vector<384xf32>
    %c33 = arith.constant 33 : index
    %c0_125 = arith.constant 0 : index
    %173 = vector.load %arg4[%c33, %c0_125] : memref<80x384xf32, #tpu.memory_space<vmem>>, vector<1x384xf32>
    %174 = vector.shape_cast %173 : vector<1x384xf32> to vector<384xf32>
    %175 = vector.shape_cast %172 : vector<384xf32> to vector<1x384xf32>
    tpu.vector_store %arg4[%c33, %c0_125], %175 {strides = array<i32>} : memref<80x384xf32, #tpu.memory_space<vmem>>, vector<1x384xf32>,
    %c0_126 = arith.constant 0 : index
    %c1_127 = arith.constant 1 : index
    %c28_128 = arith.constant 28 : index
    %176 = vector.load %arg2[%c0_126, %c1_127, %c28_128] : memref<1x3x504xf32, #tpu.memory_space<vmem>>, vector<1x1x384xf32>
    %177 = vector.shape_cast %176 : vector<1x1x384xf32> to vector<384xf32>
    %c34 = arith.constant 34 : index
    %c0_129 = arith.constant 0 : index
    %178 = vector.load %arg4[%c34, %c0_129] : memref<80x384xf32, #tpu.memory_space<vmem>>, vector<1x384xf32>
    %179 = vector.shape_cast %178 : vector<1x384xf32> to vector<384xf32>
    %180 = vector.shape_cast %177 : vector<384xf32> to vector<1x384xf32>
    tpu.vector_store %arg4[%c34, %c0_129], %180 {strides = array<i32>} : memref<80x384xf32, #tpu.memory_space<vmem>>, vector<1x384xf32>,
    %c0_130 = arith.constant 0 : index
    %c1_131 = arith.constant 1 : index
    %c48_132 = arith.constant 48 : index
    %181 = vector.load %arg2[%c0_130, %c1_131, %c48_132] : memref<1x3x504xf32, #tpu.memory_space<vmem>>, vector<1x1x384xf32>
    %182 = vector.shape_cast %181 : vector<1x1x384xf32> to vector<384xf32>
    %c35 = arith.constant 35 : index
    %c0_133 = arith.constant 0 : index
    %183 = vector.load %arg4[%c35, %c0_133] : memref<80x384xf32, #tpu.memory_space<vmem>>, vector<1x384xf32>
    %184 = vector.shape_cast %183 : vector<1x384xf32> to vector<384xf32>
    %185 = vector.shape_cast %182 : vector<384xf32> to vector<1x384xf32>
    tpu.vector_store %arg4[%c35, %c0_133], %185 {strides = array<i32>} : memref<80x384xf32, #tpu.memory_space<vmem>>, vector<1x384xf32>,
    %c0_134 = arith.constant 0 : index
    %c1_135 = arith.constant 1 : index
    %c49_136 = arith.constant 49 : index
    %186 = vector.load %arg2[%c0_134, %c1_135, %c49_136] : memref<1x3x504xf32, #tpu.memory_space<vmem>>, vector<1x1x384xf32>
    %187 = vector.shape_cast %186 : vector<1x1x384xf32> to vector<384xf32>
    %c36 = arith.constant 36 : index
    %c0_137 = arith.constant 0 : index
    %188 = vector.load %arg4[%c36, %c0_137] : memref<80x384xf32, #tpu.memory_space<vmem>>, vector<1x384xf32>
    %189 = vector.shape_cast %188 : vector<1x384xf32> to vector<384xf32>
    %190 = vector.shape_cast %187 : vector<384xf32> to vector<1x384xf32>
    tpu.vector_store %arg4[%c36, %c0_137], %190 {strides = array<i32>} : memref<80x384xf32, #tpu.memory_space<vmem>>, vector<1x384xf32>,
    %c0_138 = arith.constant 0 : index
    %c1_139 = arith.constant 1 : index
    %c50_140 = arith.constant 50 : index
    %191 = vector.load %arg2[%c0_138, %c1_139, %c50_140] : memref<1x3x504xf32, #tpu.memory_space<vmem>>, vector<1x1x384xf32>
    %192 = vector.shape_cast %191 : vector<1x1x384xf32> to vector<384xf32>
    %c37 = arith.constant 37 : index
    %c0_141 = arith.constant 0 : index
    %193 = vector.load %arg4[%c37, %c0_141] : memref<80x384xf32, #tpu.memory_space<vmem>>, vector<1x384xf32>
    %194 = vector.shape_cast %193 : vector<1x384xf32> to vector<384xf32>
    %195 = vector.shape_cast %192 : vector<384xf32> to vector<1x384xf32>
    tpu.vector_store %arg4[%c37, %c0_141], %195 {strides = array<i32>} : memref<80x384xf32, #tpu.memory_space<vmem>>, vector<1x384xf32>,
    %c0_142 = arith.constant 0 : index
    %c1_143 = arith.constant 1 : index
    %c51_144 = arith.constant 51 : index
    %196 = vector.load %arg2[%c0_142, %c1_143, %c51_144] : memref<1x3x504xf32, #tpu.memory_space<vmem>>, vector<1x1x384xf32>
    %197 = vector.shape_cast %196 : vector<1x1x384xf32> to vector<384xf32>
    %c38 = arith.constant 38 : index
    %c0_145 = arith.constant 0 : index
    %198 = vector.load %arg4[%c38, %c0_145] : memref<80x384xf32, #tpu.memory_space<vmem>>, vector<1x384xf32>
    %199 = vector.shape_cast %198 : vector<1x384xf32> to vector<384xf32>
    %200 = vector.shape_cast %197 : vector<384xf32> to vector<1x384xf32>
    tpu.vector_store %arg4[%c38, %c0_145], %200 {strides = array<i32>} : memref<80x384xf32, #tpu.memory_space<vmem>>, vector<1x384xf32>,
    %c0_146 = arith.constant 0 : index
    %c1_147 = arith.constant 1 : index
    %c52_148 = arith.constant 52 : index
    %201 = vector.load %arg2[%c0_146, %c1_147, %c52_148] : memref<1x3x504xf32, #tpu.memory_space<vmem>>, vector<1x1x384xf32>
    %202 = vector.shape_cast %201 : vector<1x1x384xf32> to vector<384xf32>
    %c39 = arith.constant 39 : index
    %c0_149 = arith.constant 0 : index
    %203 = vector.load %arg4[%c39, %c0_149] : memref<80x384xf32, #tpu.memory_space<vmem>>, vector<1x384xf32>
    %204 = vector.shape_cast %203 : vector<1x384xf32> to vector<384xf32>
    %205 = vector.shape_cast %202 : vector<384xf32> to vector<1x384xf32>
    tpu.vector_store %arg4[%c39, %c0_149], %205 {strides = array<i32>} : memref<80x384xf32, #tpu.memory_space<vmem>>, vector<1x384xf32>,
    %c0_150 = arith.constant 0 : index
    %c1_151 = arith.constant 1 : index
    %c72_152 = arith.constant 72 : index
    %206 = vector.load %arg2[%c0_150, %c1_151, %c72_152] : memref<1x3x504xf32, #tpu.memory_space<vmem>>, vector<1x1x384xf32>
    %207 = vector.shape_cast %206 : vector<1x1x384xf32> to vector<384xf32>
    %c40 = arith.constant 40 : index
    %c0_153 = arith.constant 0 : index
    %208 = vector.load %arg4[%c40, %c0_153] : memref<80x384xf32, #tpu.memory_space<vmem>>, vector<1x384xf32>
    %209 = vector.shape_cast %208 : vector<1x384xf32> to vector<384xf32>
    %210 = vector.shape_cast %207 : vector<384xf32> to vector<1x384xf32>
    tpu.vector_store %arg4[%c40, %c0_153], %210 {strides = array<i32>} : memref<80x384xf32, #tpu.memory_space<vmem>>, vector<1x384xf32>,
    %c0_154 = arith.constant 0 : index
    %c1_155 = arith.constant 1 : index
    %c73_156 = arith.constant 73 : index
    %211 = vector.load %arg2[%c0_154, %c1_155, %c73_156] : memref<1x3x504xf32, #tpu.memory_space<vmem>>, vector<1x1x384xf32>
    %212 = vector.shape_cast %211 : vector<1x1x384xf32> to vector<384xf32>
    %c41 = arith.constant 41 : index
    %c0_157 = arith.constant 0 : index
    %213 = vector.load %arg4[%c41, %c0_157] : memref<80x384xf32, #tpu.memory_space<vmem>>, vector<1x384xf32>
    %214 = vector.shape_cast %213 : vector<1x384xf32> to vector<384xf32>
    %215 = vector.shape_cast %212 : vector<384xf32> to vector<1x384xf32>
    tpu.vector_store %arg4[%c41, %c0_157], %215 {strides = array<i32>} : memref<80x384xf32, #tpu.memory_space<vmem>>, vector<1x384xf32>,
    %c0_158 = arith.constant 0 : index
    %c1_159 = arith.constant 1 : index
    %c74_160 = arith.constant 74 : index
    %216 = vector.load %arg2[%c0_158, %c1_159, %c74_160] : memref<1x3x504xf32, #tpu.memory_space<vmem>>, vector<1x1x384xf32>
    %217 = vector.shape_cast %216 : vector<1x1x384xf32> to vector<384xf32>
    %c42 = arith.constant 42 : index
    %c0_161 = arith.constant 0 : index
    %218 = vector.load %arg4[%c42, %c0_161] : memref<80x384xf32, #tpu.memory_space<vmem>>, vector<1x384xf32>
    %219 = vector.shape_cast %218 : vector<1x384xf32> to vector<384xf32>
    %220 = vector.shape_cast %217 : vector<384xf32> to vector<1x384xf32>
    tpu.vector_store %arg4[%c42, %c0_161], %220 {strides = array<i32>} : memref<80x384xf32, #tpu.memory_space<vmem>>, vector<1x384xf32>,
    %c0_162 = arith.constant 0 : index
    %c1_163 = arith.constant 1 : index
    %c75_164 = arith.constant 75 : index
    %221 = vector.load %arg2[%c0_162, %c1_163, %c75_164] : memref<1x3x504xf32, #tpu.memory_space<vmem>>, vector<1x1x384xf32>
    %222 = vector.shape_cast %221 : vector<1x1x384xf32> to vector<384xf32>
    %c43 = arith.constant 43 : index
    %c0_165 = arith.constant 0 : index
    %223 = vector.load %arg4[%c43, %c0_165] : memref<80x384xf32, #tpu.memory_space<vmem>>, vector<1x384xf32>
    %224 = vector.shape_cast %223 : vector<1x384xf32> to vector<384xf32>
    %225 = vector.shape_cast %222 : vector<384xf32> to vector<1x384xf32>
    tpu.vector_store %arg4[%c43, %c0_165], %225 {strides = array<i32>} : memref<80x384xf32, #tpu.memory_space<vmem>>, vector<1x384xf32>,
    %c0_166 = arith.constant 0 : index
    %c1_167 = arith.constant 1 : index
    %c76_168 = arith.constant 76 : index
    %226 = vector.load %arg2[%c0_166, %c1_167, %c76_168] : memref<1x3x504xf32, #tpu.memory_space<vmem>>, vector<1x1x384xf32>
    %227 = vector.shape_cast %226 : vector<1x1x384xf32> to vector<384xf32>
    %c44 = arith.constant 44 : index
    %c0_169 = arith.constant 0 : index
    %228 = vector.load %arg4[%c44, %c0_169] : memref<80x384xf32, #tpu.memory_space<vmem>>, vector<1x384xf32>
    %229 = vector.shape_cast %228 : vector<1x384xf32> to vector<384xf32>
    %230 = vector.shape_cast %227 : vector<384xf32> to vector<1x384xf32>
    tpu.vector_store %arg4[%c44, %c0_169], %230 {strides = array<i32>} : memref<80x384xf32, #tpu.memory_space<vmem>>, vector<1x384xf32>,
    %c0_170 = arith.constant 0 : index
    %c1_171 = arith.constant 1 : index
    %c96_172 = arith.constant 96 : index
    %231 = vector.load %arg2[%c0_170, %c1_171, %c96_172] : memref<1x3x504xf32, #tpu.memory_space<vmem>>, vector<1x1x384xf32>
    %232 = vector.shape_cast %231 : vector<1x1x384xf32> to vector<384xf32>
    %c45 = arith.constant 45 : index
    %c0_173 = arith.constant 0 : index
    %233 = vector.load %arg4[%c45, %c0_173] : memref<80x384xf32, #tpu.memory_space<vmem>>, vector<1x384xf32>
    %234 = vector.shape_cast %233 : vector<1x384xf32> to vector<384xf32>
    %235 = vector.shape_cast %232 : vector<384xf32> to vector<1x384xf32>
    tpu.vector_store %arg4[%c45, %c0_173], %235 {strides = array<i32>} : memref<80x384xf32, #tpu.memory_space<vmem>>, vector<1x384xf32>,
    %c0_174 = arith.constant 0 : index
    %c1_175 = arith.constant 1 : index
    %c97_176 = arith.constant 97 : index
    %236 = vector.load %arg2[%c0_174, %c1_175, %c97_176] : memref<1x3x504xf32, #tpu.memory_space<vmem>>, vector<1x1x384xf32>
    %237 = vector.shape_cast %236 : vector<1x1x384xf32> to vector<384xf32>
    %c46 = arith.constant 46 : index
    %c0_177 = arith.constant 0 : index
    %238 = vector.load %arg4[%c46, %c0_177] : memref<80x384xf32, #tpu.memory_space<vmem>>, vector<1x384xf32>
    %239 = vector.shape_cast %238 : vector<1x384xf32> to vector<384xf32>
    %240 = vector.shape_cast %237 : vector<384xf32> to vector<1x384xf32>
    tpu.vector_store %arg4[%c46, %c0_177], %240 {strides = array<i32>} : memref<80x384xf32, #tpu.memory_space<vmem>>, vector<1x384xf32>,
    %c0_178 = arith.constant 0 : index
    %c1_179 = arith.constant 1 : index
    %c98_180 = arith.constant 98 : index
    %241 = vector.load %arg2[%c0_178, %c1_179, %c98_180] : memref<1x3x504xf32, #tpu.memory_space<vmem>>, vector<1x1x384xf32>
    %242 = vector.shape_cast %241 : vector<1x1x384xf32> to vector<384xf32>
    %c47 = arith.constant 47 : index
    %c0_181 = arith.constant 0 : index
    %243 = vector.load %arg4[%c47, %c0_181] : memref<80x384xf32, #tpu.memory_space<vmem>>, vector<1x384xf32>
    %244 = vector.shape_cast %243 : vector<1x384xf32> to vector<384xf32>
    %245 = vector.shape_cast %242 : vector<384xf32> to vector<1x384xf32>
    tpu.vector_store %arg4[%c47, %c0_181], %245 {strides = array<i32>} : memref<80x384xf32, #tpu.memory_space<vmem>>, vector<1x384xf32>,
    %c0_182 = arith.constant 0 : index
    %c1_183 = arith.constant 1 : index
    %c99_184 = arith.constant 99 : index
    %246 = vector.load %arg2[%c0_182, %c1_183, %c99_184] : memref<1x3x504xf32, #tpu.memory_space<vmem>>, vector<1x1x384xf32>
    %247 = vector.shape_cast %246 : vector<1x1x384xf32> to vector<384xf32>
    %c48_185 = arith.constant 48 : index
    %c0_186 = arith.constant 0 : index
    %248 = vector.load %arg4[%c48_185, %c0_186] : memref<80x384xf32, #tpu.memory_space<vmem>>, vector<1x384xf32>
    %249 = vector.shape_cast %248 : vector<1x384xf32> to vector<384xf32>
    %250 = vector.shape_cast %247 : vector<384xf32> to vector<1x384xf32>
    tpu.vector_store %arg4[%c48_185, %c0_186], %250 {strides = array<i32>} : memref<80x384xf32, #tpu.memory_space<vmem>>, vector<1x384xf32>,
    %c0_187 = arith.constant 0 : index
    %c1_188 = arith.constant 1 : index
    %c100_189 = arith.constant 100 : index
    %251 = vector.load %arg2[%c0_187, %c1_188, %c100_189] : memref<1x3x504xf32, #tpu.memory_space<vmem>>, vector<1x1x384xf32>
    %252 = vector.shape_cast %251 : vector<1x1x384xf32> to vector<384xf32>
    %c49_190 = arith.constant 49 : index
    %c0_191 = arith.constant 0 : index
    %253 = vector.load %arg4[%c49_190, %c0_191] : memref<80x384xf32, #tpu.memory_space<vmem>>, vector<1x384xf32>
    %254 = vector.shape_cast %253 : vector<1x384xf32> to vector<384xf32>
    %255 = vector.shape_cast %252 : vector<384xf32> to vector<1x384xf32>
    tpu.vector_store %arg4[%c49_190, %c0_191], %255 {strides = array<i32>} : memref<80x384xf32, #tpu.memory_space<vmem>>, vector<1x384xf32>,
    %c0_192 = arith.constant 0 : index
    %c2_193 = arith.constant 2 : index
    %c0_194 = arith.constant 0 : index
    %256 = vector.load %arg2[%c0_192, %c2_193, %c0_194] : memref<1x3x504xf32, #tpu.memory_space<vmem>>, vector<1x1x384xf32>
    %257 = vector.shape_cast %256 : vector<1x1x384xf32> to vector<384xf32>
    %c50_195 = arith.constant 50 : index
    %c0_196 = arith.constant 0 : index
    %258 = vector.load %arg4[%c50_195, %c0_196] : memref<80x384xf32, #tpu.memory_space<vmem>>, vector<1x384xf32>
    %259 = vector.shape_cast %258 : vector<1x384xf32> to vector<384xf32>
    %260 = vector.shape_cast %257 : vector<384xf32> to vector<1x384xf32>
    tpu.vector_store %arg4[%c50_195, %c0_196], %260 {strides = array<i32>} : memref<80x384xf32, #tpu.memory_space<vmem>>, vector<1x384xf32>,
    %c0_197 = arith.constant 0 : index
    %c2_198 = arith.constant 2 : index
    %c1_199 = arith.constant 1 : index
    %261 = vector.load %arg2[%c0_197, %c2_198, %c1_199] : memref<1x3x504xf32, #tpu.memory_space<vmem>>, vector<1x1x384xf32>
    %262 = vector.shape_cast %261 : vector<1x1x384xf32> to vector<384xf32>
    %c51_200 = arith.constant 51 : index
    %c0_201 = arith.constant 0 : index
    %263 = vector.load %arg4[%c51_200, %c0_201] : memref<80x384xf32, #tpu.memory_space<vmem>>, vector<1x384xf32>
    %264 = vector.shape_cast %263 : vector<1x384xf32> to vector<384xf32>
    %265 = vector.shape_cast %262 : vector<384xf32> to vector<1x384xf32>
    tpu.vector_store %arg4[%c51_200, %c0_201], %265 {strides = array<i32>} : memref<80x384xf32, #tpu.memory_space<vmem>>, vector<1x384xf32>,
    %c0_202 = arith.constant 0 : index
    %c2_203 = arith.constant 2 : index
    %c2_204 = arith.constant 2 : index
    %266 = vector.load %arg2[%c0_202, %c2_203, %c2_204] : memref<1x3x504xf32, #tpu.memory_space<vmem>>, vector<1x1x384xf32>
    %267 = vector.shape_cast %266 : vector<1x1x384xf32> to vector<384xf32>
    %c52_205 = arith.constant 52 : index
    %c0_206 = arith.constant 0 : index
    %268 = vector.load %arg4[%c52_205, %c0_206] : memref<80x384xf32, #tpu.memory_space<vmem>>, vector<1x384xf32>
    %269 = vector.shape_cast %268 : vector<1x384xf32> to vector<384xf32>
    %270 = vector.shape_cast %267 : vector<384xf32> to vector<1x384xf32>
    tpu.vector_store %arg4[%c52_205, %c0_206], %270 {strides = array<i32>} : memref<80x384xf32, #tpu.memory_space<vmem>>, vector<1x384xf32>,
    %c0_207 = arith.constant 0 : index
    %c2_208 = arith.constant 2 : index
    %c3_209 = arith.constant 3 : index
    %271 = vector.load %arg2[%c0_207, %c2_208, %c3_209] : memref<1x3x504xf32, #tpu.memory_space<vmem>>, vector<1x1x384xf32>
    %272 = vector.shape_cast %271 : vector<1x1x384xf32> to vector<384xf32>
    %c53 = arith.constant 53 : index
    %c0_210 = arith.constant 0 : index
    %273 = vector.load %arg4[%c53, %c0_210] : memref<80x384xf32, #tpu.memory_space<vmem>>, vector<1x384xf32>
    %274 = vector.shape_cast %273 : vector<1x384xf32> to vector<384xf32>
    %275 = vector.shape_cast %272 : vector<384xf32> to vector<1x384xf32>
    tpu.vector_store %arg4[%c53, %c0_210], %275 {strides = array<i32>} : memref<80x384xf32, #tpu.memory_space<vmem>>, vector<1x384xf32>,
    %c0_211 = arith.constant 0 : index
    %c2_212 = arith.constant 2 : index
    %c4_213 = arith.constant 4 : index
    %276 = vector.load %arg2[%c0_211, %c2_212, %c4_213] : memref<1x3x504xf32, #tpu.memory_space<vmem>>, vector<1x1x384xf32>
    %277 = vector.shape_cast %276 : vector<1x1x384xf32> to vector<384xf32>
    %c54 = arith.constant 54 : index
    %c0_214 = arith.constant 0 : index
    %278 = vector.load %arg4[%c54, %c0_214] : memref<80x384xf32, #tpu.memory_space<vmem>>, vector<1x384xf32>
    %279 = vector.shape_cast %278 : vector<1x384xf32> to vector<384xf32>
    %280 = vector.shape_cast %277 : vector<384xf32> to vector<1x384xf32>
    tpu.vector_store %arg4[%c54, %c0_214], %280 {strides = array<i32>} : memref<80x384xf32, #tpu.memory_space<vmem>>, vector<1x384xf32>,
    %c0_215 = arith.constant 0 : index
    %c2_216 = arith.constant 2 : index
    %c24_217 = arith.constant 24 : index
    %281 = vector.load %arg2[%c0_215, %c2_216, %c24_217] : memref<1x3x504xf32, #tpu.memory_space<vmem>>, vector<1x1x384xf32>
    %282 = vector.shape_cast %281 : vector<1x1x384xf32> to vector<384xf32>
    %c55 = arith.constant 55 : index
    %c0_218 = arith.constant 0 : index
    %283 = vector.load %arg4[%c55, %c0_218] : memref<80x384xf32, #tpu.memory_space<vmem>>, vector<1x384xf32>
    %284 = vector.shape_cast %283 : vector<1x384xf32> to vector<384xf32>
    %285 = vector.shape_cast %282 : vector<384xf32> to vector<1x384xf32>
    tpu.vector_store %arg4[%c55, %c0_218], %285 {strides = array<i32>} : memref<80x384xf32, #tpu.memory_space<vmem>>, vector<1x384xf32>,
    %c0_219 = arith.constant 0 : index
    %c2_220 = arith.constant 2 : index
    %c25_221 = arith.constant 25 : index
    %286 = vector.load %arg2[%c0_219, %c2_220, %c25_221] : memref<1x3x504xf32, #tpu.memory_space<vmem>>, vector<1x1x384xf32>
    %287 = vector.shape_cast %286 : vector<1x1x384xf32> to vector<384xf32>
    %c56 = arith.constant 56 : index
    %c0_222 = arith.constant 0 : index
    %288 = vector.load %arg4[%c56, %c0_222] : memref<80x384xf32, #tpu.memory_space<vmem>>, vector<1x384xf32>
    %289 = vector.shape_cast %288 : vector<1x384xf32> to vector<384xf32>
    %290 = vector.shape_cast %287 : vector<384xf32> to vector<1x384xf32>
    tpu.vector_store %arg4[%c56, %c0_222], %290 {strides = array<i32>} : memref<80x384xf32, #tpu.memory_space<vmem>>, vector<1x384xf32>,
    %c0_223 = arith.constant 0 : index
    %c2_224 = arith.constant 2 : index
    %c26_225 = arith.constant 26 : index
    %291 = vector.load %arg2[%c0_223, %c2_224, %c26_225] : memref<1x3x504xf32, #tpu.memory_space<vmem>>, vector<1x1x384xf32>
    %292 = vector.shape_cast %291 : vector<1x1x384xf32> to vector<384xf32>
    %c57 = arith.constant 57 : index
    %c0_226 = arith.constant 0 : index
    %293 = vector.load %arg4[%c57, %c0_226] : memref<80x384xf32, #tpu.memory_space<vmem>>, vector<1x384xf32>
    %294 = vector.shape_cast %293 : vector<1x384xf32> to vector<384xf32>
    %295 = vector.shape_cast %292 : vector<384xf32> to vector<1x384xf32>
    tpu.vector_store %arg4[%c57, %c0_226], %295 {strides = array<i32>} : memref<80x384xf32, #tpu.memory_space<vmem>>, vector<1x384xf32>,
    %c0_227 = arith.constant 0 : index
    %c2_228 = arith.constant 2 : index
    %c27_229 = arith.constant 27 : index
    %296 = vector.load %arg2[%c0_227, %c2_228, %c27_229] : memref<1x3x504xf32, #tpu.memory_space<vmem>>, vector<1x1x384xf32>
    %297 = vector.shape_cast %296 : vector<1x1x384xf32> to vector<384xf32>
    %c58 = arith.constant 58 : index
    %c0_230 = arith.constant 0 : index
    %298 = vector.load %arg4[%c58, %c0_230] : memref<80x384xf32, #tpu.memory_space<vmem>>, vector<1x384xf32>
    %299 = vector.shape_cast %298 : vector<1x384xf32> to vector<384xf32>
    %300 = vector.shape_cast %297 : vector<384xf32> to vector<1x384xf32>
    tpu.vector_store %arg4[%c58, %c0_230], %300 {strides = array<i32>} : memref<80x384xf32, #tpu.memory_space<vmem>>, vector<1x384xf32>,
    %c0_231 = arith.constant 0 : index
    %c2_232 = arith.constant 2 : index
    %c28_233 = arith.constant 28 : index
    %301 = vector.load %arg2[%c0_231, %c2_232, %c28_233] : memref<1x3x504xf32, #tpu.memory_space<vmem>>, vector<1x1x384xf32>
    %302 = vector.shape_cast %301 : vector<1x1x384xf32> to vector<384xf32>
    %c59 = arith.constant 59 : index
    %c0_234 = arith.constant 0 : index
    %303 = vector.load %arg4[%c59, %c0_234] : memref<80x384xf32, #tpu.memory_space<vmem>>, vector<1x384xf32>
    %304 = vector.shape_cast %303 : vector<1x384xf32> to vector<384xf32>
    %305 = vector.shape_cast %302 : vector<384xf32> to vector<1x384xf32>
    tpu.vector_store %arg4[%c59, %c0_234], %305 {strides = array<i32>} : memref<80x384xf32, #tpu.memory_space<vmem>>, vector<1x384xf32>,
    %c0_235 = arith.constant 0 : index
    %c2_236 = arith.constant 2 : index
    %c48_237 = arith.constant 48 : index
    %306 = vector.load %arg2[%c0_235, %c2_236, %c48_237] : memref<1x3x504xf32, #tpu.memory_space<vmem>>, vector<1x1x384xf32>
    %307 = vector.shape_cast %306 : vector<1x1x384xf32> to vector<384xf32>
    %c60 = arith.constant 60 : index
    %c0_238 = arith.constant 0 : index
    %308 = vector.load %arg4[%c60, %c0_238] : memref<80x384xf32, #tpu.memory_space<vmem>>, vector<1x384xf32>
    %309 = vector.shape_cast %308 : vector<1x384xf32> to vector<384xf32>
    %310 = vector.shape_cast %307 : vector<384xf32> to vector<1x384xf32>
    tpu.vector_store %arg4[%c60, %c0_238], %310 {strides = array<i32>} : memref<80x384xf32, #tpu.memory_space<vmem>>, vector<1x384xf32>,
    %c0_239 = arith.constant 0 : index
    %c2_240 = arith.constant 2 : index
    %c49_241 = arith.constant 49 : index
    %311 = vector.load %arg2[%c0_239, %c2_240, %c49_241] : memref<1x3x504xf32, #tpu.memory_space<vmem>>, vector<1x1x384xf32>
    %312 = vector.shape_cast %311 : vector<1x1x384xf32> to vector<384xf32>
    %c61 = arith.constant 61 : index
    %c0_242 = arith.constant 0 : index
    %313 = vector.load %arg4[%c61, %c0_242] : memref<80x384xf32, #tpu.memory_space<vmem>>, vector<1x384xf32>
    %314 = vector.shape_cast %313 : vector<1x384xf32> to vector<384xf32>
    %315 = vector.shape_cast %312 : vector<384xf32> to vector<1x384xf32>
    tpu.vector_store %arg4[%c61, %c0_242], %315 {strides = array<i32>} : memref<80x384xf32, #tpu.memory_space<vmem>>, vector<1x384xf32>,
    %c0_243 = arith.constant 0 : index
    %c2_244 = arith.constant 2 : index
    %c50_245 = arith.constant 50 : index
    %316 = vector.load %arg2[%c0_243, %c2_244, %c50_245] : memref<1x3x504xf32, #tpu.memory_space<vmem>>, vector<1x1x384xf32>
    %317 = vector.shape_cast %316 : vector<1x1x384xf32> to vector<384xf32>
    %c62 = arith.constant 62 : index
    %c0_246 = arith.constant 0 : index
    %318 = vector.load %arg4[%c62, %c0_246] : memref<80x384xf32, #tpu.memory_space<vmem>>, vector<1x384xf32>
    %319 = vector.shape_cast %318 : vector<1x384xf32> to vector<384xf32>
    %320 = vector.shape_cast %317 : vector<384xf32> to vector<1x384xf32>
    tpu.vector_store %arg4[%c62, %c0_246], %320 {strides = array<i32>} : memref<80x384xf32, #tpu.memory_space<vmem>>, vector<1x384xf32>,
    %c0_247 = arith.constant 0 : index
    %c2_248 = arith.constant 2 : index
    %c51_249 = arith.constant 51 : index
    %321 = vector.load %arg2[%c0_247, %c2_248, %c51_249] : memref<1x3x504xf32, #tpu.memory_space<vmem>>, vector<1x1x384xf32>
    %322 = vector.shape_cast %321 : vector<1x1x384xf32> to vector<384xf32>
    %c63 = arith.constant 63 : index
    %c0_250 = arith.constant 0 : index
    %323 = vector.load %arg4[%c63, %c0_250] : memref<80x384xf32, #tpu.memory_space<vmem>>, vector<1x384xf32>
    %324 = vector.shape_cast %323 : vector<1x384xf32> to vector<384xf32>
    %325 = vector.shape_cast %322 : vector<384xf32> to vector<1x384xf32>
    tpu.vector_store %arg4[%c63, %c0_250], %325 {strides = array<i32>} : memref<80x384xf32, #tpu.memory_space<vmem>>, vector<1x384xf32>,
    %c0_251 = arith.constant 0 : index
    %c2_252 = arith.constant 2 : index
    %c52_253 = arith.constant 52 : index
    %326 = vector.load %arg2[%c0_251, %c2_252, %c52_253] : memref<1x3x504xf32, #tpu.memory_space<vmem>>, vector<1x1x384xf32>
    %327 = vector.shape_cast %326 : vector<1x1x384xf32> to vector<384xf32>
    %c64 = arith.constant 64 : index
    %c0_254 = arith.constant 0 : index
    %328 = vector.load %arg4[%c64, %c0_254] : memref<80x384xf32, #tpu.memory_space<vmem>>, vector<1x384xf32>
    %329 = vector.shape_cast %328 : vector<1x384xf32> to vector<384xf32>
    %330 = vector.shape_cast %327 : vector<384xf32> to vector<1x384xf32>
    tpu.vector_store %arg4[%c64, %c0_254], %330 {strides = array<i32>} : memref<80x384xf32, #tpu.memory_space<vmem>>, vector<1x384xf32>,
    %c0_255 = arith.constant 0 : index
    %c2_256 = arith.constant 2 : index
    %c72_257 = arith.constant 72 : index
    %331 = vector.load %arg2[%c0_255, %c2_256, %c72_257] : memref<1x3x504xf32, #tpu.memory_space<vmem>>, vector<1x1x384xf32>
    %332 = vector.shape_cast %331 : vector<1x1x384xf32> to vector<384xf32>
    %c65 = arith.constant 65 : index
    %c0_258 = arith.constant 0 : index
    %333 = vector.load %arg4[%c65, %c0_258] : memref<80x384xf32, #tpu.memory_space<vmem>>, vector<1x384xf32>
    %334 = vector.shape_cast %333 : vector<1x384xf32> to vector<384xf32>
    %335 = vector.shape_cast %332 : vector<384xf32> to vector<1x384xf32>
    tpu.vector_store %arg4[%c65, %c0_258], %335 {strides = array<i32>} : memref<80x384xf32, #tpu.memory_space<vmem>>, vector<1x384xf32>,
    %c0_259 = arith.constant 0 : index
    %c2_260 = arith.constant 2 : index
    %c73_261 = arith.constant 73 : index
    %336 = vector.load %arg2[%c0_259, %c2_260, %c73_261] : memref<1x3x504xf32, #tpu.memory_space<vmem>>, vector<1x1x384xf32>
    %337 = vector.shape_cast %336 : vector<1x1x384xf32> to vector<384xf32>
    %c66 = arith.constant 66 : index
    %c0_262 = arith.constant 0 : index
    %338 = vector.load %arg4[%c66, %c0_262] : memref<80x384xf32, #tpu.memory_space<vmem>>, vector<1x384xf32>
    %339 = vector.shape_cast %338 : vector<1x384xf32> to vector<384xf32>
    %340 = vector.shape_cast %337 : vector<384xf32> to vector<1x384xf32>
    tpu.vector_store %arg4[%c66, %c0_262], %340 {strides = array<i32>} : memref<80x384xf32, #tpu.memory_space<vmem>>, vector<1x384xf32>,
    %c0_263 = arith.constant 0 : index
    %c2_264 = arith.constant 2 : index
    %c74_265 = arith.constant 74 : index
    %341 = vector.load %arg2[%c0_263, %c2_264, %c74_265] : memref<1x3x504xf32, #tpu.memory_space<vmem>>, vector<1x1x384xf32>
    %342 = vector.shape_cast %341 : vector<1x1x384xf32> to vector<384xf32>
    %c67 = arith.constant 67 : index
    %c0_266 = arith.constant 0 : index
    %343 = vector.load %arg4[%c67, %c0_266] : memref<80x384xf32, #tpu.memory_space<vmem>>, vector<1x384xf32>
    %344 = vector.shape_cast %343 : vector<1x384xf32> to vector<384xf32>
    %345 = vector.shape_cast %342 : vector<384xf32> to vector<1x384xf32>
    tpu.vector_store %arg4[%c67, %c0_266], %345 {strides = array<i32>} : memref<80x384xf32, #tpu.memory_space<vmem>>, vector<1x384xf32>,
    %c0_267 = arith.constant 0 : index
    %c2_268 = arith.constant 2 : index
    %c75_269 = arith.constant 75 : index
    %346 = vector.load %arg2[%c0_267, %c2_268, %c75_269] : memref<1x3x504xf32, #tpu.memory_space<vmem>>, vector<1x1x384xf32>
    %347 = vector.shape_cast %346 : vector<1x1x384xf32> to vector<384xf32>
    %c68 = arith.constant 68 : index
    %c0_270 = arith.constant 0 : index
    %348 = vector.load %arg4[%c68, %c0_270] : memref<80x384xf32, #tpu.memory_space<vmem>>, vector<1x384xf32>
    %349 = vector.shape_cast %348 : vector<1x384xf32> to vector<384xf32>
    %350 = vector.shape_cast %347 : vector<384xf32> to vector<1x384xf32>
    tpu.vector_store %arg4[%c68, %c0_270], %350 {strides = array<i32>} : memref<80x384xf32, #tpu.memory_space<vmem>>, vector<1x384xf32>,
    %c0_271 = arith.constant 0 : index
    %c2_272 = arith.constant 2 : index
    %c76_273 = arith.constant 76 : index
    %351 = vector.load %arg2[%c0_271, %c2_272, %c76_273] : memref<1x3x504xf32, #tpu.memory_space<vmem>>, vector<1x1x384xf32>
    %352 = vector.shape_cast %351 : vector<1x1x384xf32> to vector<384xf32>
    %c69 = arith.constant 69 : index
    %c0_274 = arith.constant 0 : index
    %353 = vector.load %arg4[%c69, %c0_274] : memref<80x384xf32, #tpu.memory_space<vmem>>, vector<1x384xf32>
    %354 = vector.shape_cast %353 : vector<1x384xf32> to vector<384xf32>
    %355 = vector.shape_cast %352 : vector<384xf32> to vector<1x384xf32>
    tpu.vector_store %arg4[%c69, %c0_274], %355 {strides = array<i32>} : memref<80x384xf32, #tpu.memory_space<vmem>>, vector<1x384xf32>,
    %c0_275 = arith.constant 0 : index
    %c2_276 = arith.constant 2 : index
    %c96_277 = arith.constant 96 : index
    %356 = vector.load %arg2[%c0_275, %c2_276, %c96_277] : memref<1x3x504xf32, #tpu.memory_space<vmem>>, vector<1x1x384xf32>
    %357 = vector.shape_cast %356 : vector<1x1x384xf32> to vector<384xf32>
    %c70 = arith.constant 70 : index
    %c0_278 = arith.constant 0 : index
    %358 = vector.load %arg4[%c70, %c0_278] : memref<80x384xf32, #tpu.memory_space<vmem>>, vector<1x384xf32>
    %359 = vector.shape_cast %358 : vector<1x384xf32> to vector<384xf32>
    %360 = vector.shape_cast %357 : vector<384xf32> to vector<1x384xf32>
    tpu.vector_store %arg4[%c70, %c0_278], %360 {strides = array<i32>} : memref<80x384xf32, #tpu.memory_space<vmem>>, vector<1x384xf32>,
    %c0_279 = arith.constant 0 : index
    %c2_280 = arith.constant 2 : index
    %c97_281 = arith.constant 97 : index
    %361 = vector.load %arg2[%c0_279, %c2_280, %c97_281] : memref<1x3x504xf32, #tpu.memory_space<vmem>>, vector<1x1x384xf32>
    %362 = vector.shape_cast %361 : vector<1x1x384xf32> to vector<384xf32>
    %c71 = arith.constant 71 : index
    %c0_282 = arith.constant 0 : index
    %363 = vector.load %arg4[%c71, %c0_282] : memref<80x384xf32, #tpu.memory_space<vmem>>, vector<1x384xf32>
    %364 = vector.shape_cast %363 : vector<1x384xf32> to vector<384xf32>
    %365 = vector.shape_cast %362 : vector<384xf32> to vector<1x384xf32>
    tpu.vector_store %arg4[%c71, %c0_282], %365 {strides = array<i32>} : memref<80x384xf32, #tpu.memory_space<vmem>>, vector<1x384xf32>,
    %c0_283 = arith.constant 0 : index
    %c2_284 = arith.constant 2 : index
    %c98_285 = arith.constant 98 : index
    %366 = vector.load %arg2[%c0_283, %c2_284, %c98_285] : memref<1x3x504xf32, #tpu.memory_space<vmem>>, vector<1x1x384xf32>
    %367 = vector.shape_cast %366 : vector<1x1x384xf32> to vector<384xf32>
    %c72_286 = arith.constant 72 : index
    %c0_287 = arith.constant 0 : index
    %368 = vector.load %arg4[%c72_286, %c0_287] : memref<80x384xf32, #tpu.memory_space<vmem>>, vector<1x384xf32>
    %369 = vector.shape_cast %368 : vector<1x384xf32> to vector<384xf32>
    %370 = vector.shape_cast %367 : vector<384xf32> to vector<1x384xf32>
    tpu.vector_store %arg4[%c72_286, %c0_287], %370 {strides = array<i32>} : memref<80x384xf32, #tpu.memory_space<vmem>>, vector<1x384xf32>,
    %c0_288 = arith.constant 0 : index
    %c2_289 = arith.constant 2 : index
    %c99_290 = arith.constant 99 : index
    %371 = vector.load %arg2[%c0_288, %c2_289, %c99_290] : memref<1x3x504xf32, #tpu.memory_space<vmem>>, vector<1x1x384xf32>
    %372 = vector.shape_cast %371 : vector<1x1x384xf32> to vector<384xf32>
    %c73_291 = arith.constant 73 : index
    %c0_292 = arith.constant 0 : index
    %373 = vector.load %arg4[%c73_291, %c0_292] : memref<80x384xf32, #tpu.memory_space<vmem>>, vector<1x384xf32>
    %374 = vector.shape_cast %373 : vector<1x384xf32> to vector<384xf32>
    %375 = vector.shape_cast %372 : vector<384xf32> to vector<1x384xf32>
    tpu.vector_store %arg4[%c73_291, %c0_292], %375 {strides = array<i32>} : memref<80x384xf32, #tpu.memory_space<vmem>>, vector<1x384xf32>,
    %c0_293 = arith.constant 0 : index
    %c2_294 = arith.constant 2 : index
    %c100_295 = arith.constant 100 : index
    %376 = vector.load %arg2[%c0_293, %c2_294, %c100_295] : memref<1x3x504xf32, #tpu.memory_space<vmem>>, vector<1x1x384xf32>
    %377 = vector.shape_cast %376 : vector<1x1x384xf32> to vector<384xf32>
    %c74_296 = arith.constant 74 : index
    %c0_297 = arith.constant 0 : index
    %378 = vector.load %arg4[%c74_296, %c0_297] : memref<80x384xf32, #tpu.memory_space<vmem>>, vector<1x384xf32>
    %379 = vector.shape_cast %378 : vector<1x384xf32> to vector<384xf32>
    %380 = vector.shape_cast %377 : vector<384xf32> to vector<1x384xf32>
    tpu.vector_store %arg4[%c74_296, %c0_297], %380 {strides = array<i32>} : memref<80x384xf32, #tpu.memory_space<vmem>>, vector<1x384xf32>,
    %c0_298 = arith.constant 0 : index
    %c0_299 = arith.constant 0 : index
    %381 = vector.load %arg1[%c0_298, %c0_299] : memref<16x80xf32, #tpu.memory_space<vmem>>, vector<16x80xf32>
    %c0_300 = arith.constant 0 : index
    %c0_301 = arith.constant 0 : index
    %382 = vector.load %arg4[%c0_300, %c0_301] : memref<80x384xf32, #tpu.memory_space<vmem>>, vector<80x384xf32>
    %cst_302 = arith.constant dense<0.000000e+00> : vector<16x384xf32>
    %383 = tpu.matmul %381, %382, %cst_302 {dimension_numbers = #tpu.dot_dimension_numbers<[1], [0], [0], [1], [0, 0, 1, 1], [], []>, precision = #tpu.contract_precision<fp32>} : vector<16x80xf32>, vector<80x384xf32>, vector<16x384xf32> -> vector<16x384xf32>
    %cst_303 = arith.constant 0.000000e+00 : f32
    %384 = vector.broadcast %cst_303 : f32 to vector<16x384xf32>
    %385 = arith.maximumf %383, %384 : vector<16x384xf32>
    %c0_304 = arith.constant 0 : index
    %c0_305 = arith.constant 0 : index
    %c0_306 = arith.constant 0 : index
    %386 = vector.load %arg3[%c0_304, %c0_305, %c0_306] : memref<1x16x384xf32, #tpu.memory_space<vmem>>, vector<1x16x384xf32>
    %387 = vector.shape_cast %386 : vector<1x16x384xf32> to vector<16x384xf32>
    %388 = vector.shape_cast %385 : vector<16x384xf32> to vector<1x16x384xf32>
    tpu.vector_store %arg3[%c0_304, %c0_305, %c0_306], %388 {strides = array<i32>} : memref<1x16x384xf32, #tpu.memory_space<vmem>>, vector<1x16x384xf32>,
    return
  }
  func.func @transform_0(%arg0: i32) -> (i32, i32) {
    %c0_i32 = arith.constant 0 : i32
    %c0_i32_0 = arith.constant 0 : i32
    %c0_i32_1 = arith.constant 0 : i32
    return %c0_i32, %c0_i32_0 : i32, i32
  }
  func.func @transform_1(%arg0: i32) -> (i32, i32, i32) {
    %c0_i32 = arith.constant 0 : i32
    %c0_i32_0 = arith.constant 0 : i32
    %c0_i32_1 = arith.constant 0 : i32
    return %arg0, %c0_i32, %c0_i32_0 : i32, i32, i32
  }
  func.func @transform_2(%arg0: i32) -> (i32, i32, i32) {
    %c0_i32 = arith.constant 0 : i32
    %c0_i32_0 = arith.constant 0 : i32
    %c0_i32_1 = arith.constant 0 : i32
    return %arg0, %c0_i32, %c0_i32_0 : i32, i32, i32
  }
}

</mosaic_0001>

<bundles_post_ra>
// kernel: tpu_custom_call.1
= control target key start
LH: loop header
LB: loop body
LE: loop exit
PB: predicated region body
PF: predicated region fallthrough
CT: control target
= control target key end

     0   :  { %7 = vsyncpa [#allocation4], 0  ;;  %s3897_s0 = inlined_call_operand.vmem [shape: f32[16,80], index: 0, kind: input, shape index: {}]   ;;  %s3898_s1 = inlined_call_operand.vmem [shape: f32[2,3,504], index: 1, kind: input, shape index: {}]   ;;  %s3899_s2 = inlined_call_operand.hbm [shape: f32[2,16,384], index: 2, kind: output, shape index: {}]  }
   0x1   :  { %9 = vsyncpa [#allocation4 + $0x1], 0  ;;  %s2834_s9 = smov 0   ;;  %s2836_s10 = smov 0  }
   0x2   :  { %s2838_s11 = smov 0   ;;  %s2840_s12 = smov 0  }
   0x3 LB: > { %s2855_s13 = sadd.s32 4294967295, %s2788_s12   ;;  %s2389_s14 = sadd.s32 4294967294, %s2788_s12   ;;  %s2788_s12 = sphi %s2840_s12, %s3984_s12   ;;  %s2784_s11 = sphi %s2838_s11, %s3983_s11   ;;  %s2780_s10 = sphi %s2836_s10, %s3982_s10   ;;  %s2776_s9 = sphi %s2834_s9, %s3981_s9  }
   0x4   : > { %s2859_s15 = sadd.s32 1, %s2788_s12   ;;  %s69_s16 = sadd.s32 1, %s2784_s11 }
   0x5   : > { %s66_s17 = ssub.s32 %s2788_s12, %s2859_s15  ;;  %p79_p0 = scmp.ne.s32.totalorder %s2784_s11, %s2780_s10 }
   0x6   : > { %p67_p1 = scmp.eq.s32.totalorder %s66_s17, 0  ;;  %p80_p2 = scmp.eq.s32.totalorder %s2855_s13, 1 }
   0x7   : > { %p85_p3 = scmp.ne.s32.totalorder %s2780_s10, %s2776_s9  ;;  %p86_p4 = scmp.eq.s32.totalorder %s2389_s14, 1 }
   0x8   : > { %s2870_s18 = scalar_select %p67_p1, %s2784_s11, %s69_s16  }
   0x9   : > { %p2872_p5 = por %p80_p2, %p79_p0  ;;  %p2876_p6 = por %p86_p4, %p85_p3 }
   0xa   : > { %p2392_p7 = scmp.ge.s32.totalorder %s2788_s12, 1  ;;  %p115_p8 = scmp.lt.s32.totalorder %s2788_s12, 3 }
   0xc   : > { %p116_p9 = pnand %p2392_p7, %p115_p8 }
   0xd   : > { %p137_p10 = scmp.lt.s32.totalorder (!%p116_p9), %s2855_s13, 1  ;;  %s3907_s26 = smov (!%p116_p9), 28  }
   0xe   : > { %119 = sbr.rel (%p116_p9) target bundleno = 630 (0x276), region = 28  ;;  %s2793_s27 = smov (!%p116_p9), 30  }
   0xf   : > { %s3906_s28 = smov (!%p116_p9), 29   ;;  %s3902_s29 = smov (!%p116_p9), 76  }
  0x10   : > { %s3911_s30 = smov (!%p116_p9), 56   ;;  %s2797_s3 = smov (!%p116_p9), 55  }
  0x11   : > { %s2798_s4 = smov (!%p116_p9), 54   ;;  %s2799_s5 = smov (!%p116_p9), 53  }
  0x12   : > { %s2800_s6 = smov (!%p116_p9), 52   ;;  %s2801_s7 = smov (!%p116_p9), 32  }
  0x13   : > { %v142_v0 = vlaneseq  ;;  %s138_s21 = scalar_select %p137_p10, %s2855_s13, 1  ;;  %v2790_v2 = vmov 0.0   ;;  %v2791_v3 = vmov 1.0   ;;  %vm3921_vm1 = vcmask 228352  }
  0x14   : > { %150 = vst [vmem:[#allocation2 + $0xe0] sm:$0xf0] %v2790_v2  ;;  %149 = vst [vmem:[#allocation2 + $0xd8] sm:$0xf0] %v2790_v2  ;;  %1031 = vmatprep.mubr.f32.mxu0 %v2790_v2  ;;  %1218 = vmatprep.mubr.f32.mxu1 %v2790_v2  ;;  %s2802_s8 = smov 31   ;;  %s3900_s14 = smov 103  }
  0x15   : > { %vm2884_vm0 = vcmp.lt.s32.totalorder %v142_v0, 384  ;;  %151 = vst [vmem:[#allocation2 + $0xe8] sm:$0xf0] %v2790_v2  ;;  %s2448_s22 = sshll.u32 %s138_s21, 4  ;;  %s3910_s16 = smov 102   ;;  %vm3924_vm2 = vcmask 244736  }
  0x16   : > { %147 = vst.msk [vmem:[#allocation2 + $0xdb] ss:$8 sm:$0x7] %vm2884_vm0, %v2791_v3  ;;  %s2898_s25 = scalar_lea.vmem %s3898_s1, %s2448_s22  ;;  %s2805_s17 = smov 101   ;;  %vm3919_vm3 = vcmask 236544   ;;  %vm3915_vm4 = vcmask 621568  }
  0x17   : > { %v2444_v4 = vld [vmem:[%s2898_s25 + $0x2] ss:$4 sm:$0xf]  ;;  %s3913_s21 = smov 100   ;;  %s3912_s22 = smov 80   ;;  %vm3923_vm5 = vcmask 457728  }
  0x18   : > { %v2442_v5 = vld [vmem:[%s2898_s25 + $0x2] ss:$4 sm:$0xf]  ;;  %901 = vrot.lane.b32.xlu1 %v2444_v4, %s3907_s26  ;;  %s2808_s23 = smov 79   ;;  %s2809_s24 = smov 78   ;;  %vm325_vm6 = vcmask 449536  }
  0x19   : > { %881 = vrot.lane.b32.xlu0 %v2442_v5, %s2793_s27  ;;  %v2443_v6 = vld [vmem:[%s2898_s25 + $0x2] ss:$4 sm:$0xf]  ;;  %v2418_v23 = vld [vmem:[%s2898_s25 + $0x1] ss:$4 sm:$0xf] }
  0x1a   : > { %v2434_v7 = vld [vmem:[%s2898_s25 + $0x2] ss:$4 sm:$0xf]  ;;  %v2419_v24 = vld [vmem:[%s2898_s25 + $0x1] ss:$4 sm:$0xf] }
  0x1b   : > { %v2435_v8 = vld [vmem:[%s2898_s25 + $0x2] ss:$4 sm:$0xf]  ;;  %v2411_v31 = vld [vmem:[%s2898_s25 + $0x1] ss:$4 sm:$0xf] }
  0x1c   : > { %801 = vrot.lane.b32.xlu1 %v2434_v7, %s3902_s29  ;;  %v2436_v9 = vld [vmem:[%s2898_s25 + $0x2] ss:$4 sm:$0xf]  ;;  %s3908_s29 = smov 127   ;;  %vm336_vm7 = vcmask 441344   ;;  %vm347_vm8 = vcmask 433152  }
  0x1d   : > { %891 = vrot.lane.b32.xlu0 %v2443_v6, %s3906_s28  ;;  %v2437_v10 = vld [vmem:[%s2898_s25 + $0x2] ss:$4 sm:$0xf]  ;;  %v2410_v32 = vld [vmem:[%s2898_s25 + $0x1] ss:$4 sm:$0xf] }
  0x1e   : > { %v2438_v11 = vld [vmem:[%s2898_s25 + $0x2] ss:$4 sm:$0xf]  ;;  %v2413_v33 = vld [vmem:[%s2898_s25 + $0x1] ss:$4 sm:$0xf] }
  0x1f   : > { %v2439_v12 = vld [vmem:[%s2898_s25 + $0x2] ss:$4 sm:$0xf]  ;;  %v2412_v34 = vld [vmem:[%s2898_s25 + $0x1] ss:$4 sm:$0xf] }
  0x20   : > { %821 = vrot.lane.b32.xlu1 %v2436_v9, %s2797_s3  ;;  %v2440_v13 = vld [vmem:[%s2898_s25 + $0x2] ss:$4 sm:$0xf]  ;;  %v2415_v35 = vld [vmem:[%s2898_s25 + $0x1] ss:$4 sm:$0xf] }
  0x21   : > { %811 = vrot.lane.b32.xlu0 %v2435_v8, %s3911_s30  ;;  %v2441_v14 = vld [vmem:[%s2898_s25 + $0x2] ss:$4 sm:$0xf]  ;;  %v2414_v36 = vld [vmem:[%s2898_s25 + $0x1] ss:$4 sm:$0xf] }
  0x22   : > { %v2426_v15 = vld [vmem:[%s2898_s25 + $0x2] ss:$4 sm:$0xf]  ;;  %v2417_v37 = vld [vmem:[%s2898_s25 + $0x1] ss:$4 sm:$0xf] }
  0x23   : > { %v2427_v16 = vld [vmem:[%s2898_s25 + $0x2] ss:$4 sm:$0xf]  ;;  %v2416_v38 = vld [vmem:[%s2898_s25 + $0x1] ss:$4 sm:$0xf] }
  0x24   : > { %841 = vrot.lane.b32.xlu1 %v2438_v11, %s2799_s5  ;;  %v2428_v17 = vld [vmem:[%s2898_s25 + $0x2] ss:$4 sm:$0xf]  ;;  %v2403_v39 = vld [vmem:[%s2898_s25 + $0x1] ss:$4 sm:$0xf] }
  0x25   : > { %831 = vrot.lane.b32.xlu0 %v2437_v10, %s2798_s4  ;;  %v2429_v18 = vld [vmem:[%s2898_s25 + $0x2] ss:$4 sm:$0xf]  ;;  %v2402_v40 = vld [vmem:[%s2898_s25 + $0x1] ss:$4 sm:$0xf] }
  0x26   : > { %v2430_v19 = vld [vmem:[%s2898_s25 + $0x2] ss:$4 sm:$0xf]  ;;  %v2405_v41 = vld [vmem:[%s2898_s25 + $0x1] ss:$4 sm:$0xf] }
  0x27   : > { %v2431_v20 = vld [vmem:[%s2898_s25 + $0x2] ss:$4 sm:$0xf]  ;;  %v2404_v42 = vld [vmem:[%s2898_s25 + $0x1] ss:$4 sm:$0xf] }
  0x28   : > { %861 = vrot.lane.b32.xlu1 %v2440_v13, %s2801_s7  ;;  %v2432_v21 = vld [vmem:[%s2898_s25 + $0x2] ss:$4 sm:$0xf]  ;;  %v2407_v43 = vld [vmem:[%s2898_s25 + $0x1] ss:$4 sm:$0xf] }
  0x29   : > { %851 = vrot.lane.b32.xlu0 %v2439_v12, %s2800_s6  ;;  %v2433_v22 = vld [vmem:[%s2898_s25 + $0x2] ss:$4 sm:$0xf]  ;;  %v2406_v44 = vld [vmem:[%s2898_s25 + $0x1] ss:$4 sm:$0xf] }
  0x2a   : > { %v2421_v25 = vld [vmem:[%s2898_s25 + $0x2] ss:$4 sm:$0xf]  ;;  %v2409_v45 = vld [vmem:[%s2898_s25 + $0x1] ss:$4 sm:$0xf] }
  0x2b   : > { %v2422_v26 = vld [vmem:[%s2898_s25 + $0x2] ss:$4 sm:$0xf]  ;;  %v2408_v46 = vld [vmem:[%s2898_s25 + $0x1] ss:$4 sm:$0xf] }
  0x2c   : > { %721 = vrot.lane.b32.xlu1 %v2426_v15, %s3900_s14  ;;  %s3904_s14 = smov 77   ;;  %v2423_v27 = vld [vmem:[%s2898_s25 + $0x2] ss:$4 sm:$0xf]  ;;  %vm358_vm9 = vcmask 424960   ;;  %vm369_vm10 = vcmask 261120  }
  0x2d   : > { %871 = vrot.lane.b32.xlu0 %v2441_v14, %s2802_s8  ;;  %v2420_v28 = vld [vmem:[%s2898_s25 + $0x2] ss:$4 sm:$0x7]  ;;  %v2396_v47 = vld [vmem:[%s2898_s25 + $0x1] ss:$4 sm:$0xf] }
  0x2e   : > { %667 = vst.msk [vmem:[#allocation2 + $0x92] ss:$8 sm:$0x7] %vm2884_vm0, %v2420_v28  ;;  %v2424_v29 = vld [vmem:[%s2898_s25 + $0x2] ss:$4 sm:$0xf] }
  0x2f   : > { %v2425_v30 = vld [vmem:[%s2898_s25 + $0x2] ss:$4 sm:$0xf]  ;;  %v408_v48 = vld [vmem:[%s2898_s25] ss:$4 sm:$0xf] }
  0x30   : > { %741 = vrot.lane.b32.xlu1 %v2428_v17, %s2805_s17  ;;  %v2398_v49 = vld [vmem:[%s2898_s25 + $0x1] ss:$4 sm:$0xf]  ;;  %v320_v55 = vld [vmem:[%s2898_s25] ss:$4 sm:$0xf] }
  0x31   : > { %731 = vrot.lane.b32.xlu0 %v2427_v16, %s3910_s16  ;;  %v2397_v50 = vld [vmem:[%s2898_s25 + $0x1] ss:$4 sm:$0xf]  ;;  %v331_v56 = vld [vmem:[%s2898_s25] ss:$4 sm:$0xf] }
  0x32   : > { %v2395_v51 = vld [vmem:[%s2898_s25 + $0x1] ss:$4 sm:$0x7]  ;;  %v342_v57 = vld [vmem:[%s2898_s25] ss:$4 sm:$0xf] }
  0x33   : > { %422 = vst.msk [vmem:[#allocation2 + $0x49] ss:$8 sm:$0x7] %vm2884_vm0, %v2395_v51  ;;  %v2400_v52 = vld [vmem:[%s2898_s25 + $0x1] ss:$4 sm:$0xf] }
  0x34   : > { %761 = vrot.lane.b32.xlu1 %v2430_v19, %s3912_s22  ;;  %v2399_v53 = vld [vmem:[%s2898_s25 + $0x1] ss:$4 sm:$0xf]  ;;  %v353_v58 = vld [vmem:[%s2898_s25] ss:$4 sm:$0xf] }
  0x35   : > { %751 = vrot.lane.b32.xlu0 %v2429_v18, %s3913_s21  ;;  %v2401_v54 = vld [vmem:[%s2898_s25 + $0x1] ss:$4 sm:$0xf]  ;;  %v364_v59 = vld [vmem:[%s2898_s25] ss:$4 sm:$0xf] }
  0x36   : > { %v375_v60 = vld [vmem:[%s2898_s25] ss:$4 sm:$0xf]  ;;  %vm380_vm11 = vcmask 252928   ;;  %vm3914_vm12 = vcmask 842752   ;;  %vm3916_vm13 = vcmask 834560  }
  0x37   : > { %v386_v61 = vld [vmem:[%s2898_s25] ss:$4 sm:$0xf]  ;;  %vm237_vm14 = vcmask 826368   ;;  %vm3917_vm15 = vcmask 818176  }
  0x38   : > { %781 = vrot.lane.b32.xlu1 %v2432_v21, %s2809_s24  ;;  %v397_v62 = vld [vmem:[%s2898_s25] ss:$4 sm:$0xf] }
  0x39   : > { %771 = vrot.lane.b32.xlu0 %v2431_v20, %s2808_s23  ;;  %v232_v63 = vld [vmem:[%s2898_s25] ss:$4 sm:$0xf] }
  0x3a   : > { %v243_v0 = vld [vmem:[%s2898_s25] ss:$4 sm:$0xf] }
  0x3b   : > { %v254_v3 = vld [vmem:[%s2898_s25] ss:$4 sm:$0xf] }
  0x3c   : > { %646 = vrot.lane.b32.xlu1 %v2418_v23, %s3906_s28  ;;  %s2813_s28 = smov 125   ;;  %v265_v10 = vld [vmem:[%s2898_s25] ss:$4 sm:$0xf] }
  0x3d   : > { %791 = vrot.lane.b32.xlu0 %v2433_v22, %s3904_s14  ;;  %s2812_s14 = smov 126   ;;  %v276_v11 = vld [vmem:[%s2898_s25] ss:$4 sm:$0xf] }
  0x3e   : > { %v287_v18 = vld [vmem:[%s2898_s25] ss:$4 sm:$0xf] }
  0x3f   : > { %v298_v19 = vld [vmem:[%s2898_s25] ss:$4 sm:$0xf] }
  0x40   : > { %671 = vrot.lane.b32.xlu1 %v2421_v25, %s3908_s29  ;;  %s2815_s29 = smov 104  }
  0x41   : > { %656 = vrot.lane.b32.xlu0 %v2419_v24, %s3907_s26  ;;  %s2814_s26 = smov 124  }
  0x44   : > { %691 = vrot.lane.b32.xlu1 %v2423_v27, %s2813_s28  ;;  %v155_v27 = vld [vmem:[%s2898_s25] ss:$4 sm:$0xf] }
  0x45   : > { %681 = vrot.lane.b32.xlu0 %v2422_v26, %s2812_s14  ;;  %v309_v26 = vld [vmem:[%s2898_s25] ss:$4 sm:$0xf] }
  0x48   : > { %711 = vrot.lane.b32.xlu1 %v2425_v30, %s2815_s29 }
  0x49   : > { %701 = vrot.lane.b32.xlu0 %v2424_v29, %s2814_s26 }
  0x4c   : > { %576 = vrot.lane.b32.xlu1 %v2411_v31, %s2797_s3 }
  0x4d   : > { %566 = vrot.lane.b32.xlu0 %v2410_v32, %s3911_s30  ;;  %s3941_s30 = smov 77   ;;  %v166_v32 = vld [vmem:[%s2898_s25] ss:$4 sm:$0xf] }
  0x50   : > { %596 = vrot.lane.b32.xlu1 %v2413_v33, %s2799_s5 }
  0x51   : > { %586 = vrot.lane.b32.xlu0 %v2412_v34, %s2798_s4 }
  0x54   : > { %616 = vrot.lane.b32.xlu1 %v2415_v35, %s2801_s7 }
  0x55   : > { %606 = vrot.lane.b32.xlu0 %v2414_v36, %s2800_s6  ;;  %v177_v36 = vld [vmem:[%s2898_s25] ss:$4 sm:$0xf] }
  0x58   : > { %636 = vrot.lane.b32.xlu1 %v2417_v37, %s2793_s27 }
  0x59   : > { %626 = vrot.lane.b32.xlu0 %v2416_v38, %s2802_s8 }
  0x5c   : > { %496 = vrot.lane.b32.xlu1 %v2403_v39, %s2805_s17 }
  0x5d   : > { %486 = vrot.lane.b32.xlu0 %v2402_v40, %s3910_s16  ;;  %s3940_s16 = smov 76  }
  0x60   : > { %516 = vrot.lane.b32.xlu1 %v2405_v41, %s3912_s22  ;;  %s3942_s22 = smov 127  }
  0x61   : > { %506 = vrot.lane.b32.xlu0 %v2404_v42, %s3913_s21  ;;  %s3943_s21 = smov 28   ;;  %v152_v42 = vld [vmem:[%s2898_s25] ss:$4 sm:$0x7] }
  0x62   : > { %153 = vst.msk [vmem:[#allocation2] ss:$8 sm:$0x7] %vm2884_vm0, %v152_v42 }
  0x64   : > { %536 = vrot.lane.b32.xlu1 %v2407_v43, %s2809_s24 }
  0x65   : > { %526 = vrot.lane.b32.xlu0 %v2406_v44, %s2808_s23 }
  0x68   : > { %556 = vrot.lane.b32.xlu1 %v2409_v45, %s3940_s16 }
  0x69   : > { %546 = vrot.lane.b32.xlu0 %v2408_v46, %s3941_s30 }
  0x6c   : > { %426 = vrot.lane.b32.xlu1 %v2396_v47, %s3942_s22 }
  0x6d   : > { %410 = vrot.lane.b32.xlu0 %v408_v48, %s3943_s21  ;;  %s3944_s21 = smov 103  }
  0x70   : > { %446 = vrot.lane.b32.xlu1 %v2398_v49, %s2813_s28  ;;  %v188_v49 = vld [vmem:[%s2898_s25] ss:$4 sm:$0xf] }
  0x71   : > { %436 = vrot.lane.b32.xlu0 %v2397_v50, %s2812_s14 }
  0x74   : > { %466 = vrot.lane.b32.xlu1 %v2400_v52, %s2815_s29  ;;  %v199_v52 = vld [vmem:[%s2898_s25] ss:$4 sm:$0xf] }
  0x75   : > { %456 = vrot.lane.b32.xlu0 %v2399_v53, %s2814_s26 }
  0x78   : > { %322 = vrot.lane.b32.xlu1 %v320_v55, %s2797_s3  ;;  %s3945_s3 = smov 29  }
  0x79   : > { %476 = vrot.lane.b32.xlu0 %v2401_v54, %s3944_s21 }
  0x7c   : > { %344 = vrot.lane.b32.xlu1 %v342_v57, %s2799_s5  ;;  %s3947_s5 = smov 80  }
  0x7d   : > { %333 = vrot.lane.b32.xlu0 %v331_v56, %s2798_s4  ;;  %s3946_s4 = smov 100  }
  0x80   : > { %366 = vrot.lane.b32.xlu1 %v364_v59, %s2801_s7 }
  0x81   : > { %355 = vrot.lane.b32.xlu0 %v353_v58, %s2800_s6  ;;  %s134_s6 = sand.u32 1, %s2780_s10  }
  0x82   : > { %s2659_s7 = smul.u32 48, %s134_s6 }
  0x84   : > { %388 = vrot.lane.b32.xlu1 %v386_v61, %s2793_s27  ;;  %s3948_s27 = smov 56   ;;  %v210_v61 = vld [vmem:[%s2898_s25] ss:$4 sm:$0xf] }
  0x85   : > { %377 = vrot.lane.b32.xlu0 %v375_v60, %s2802_s8  ;;  %s3838_s8 = scalar_lea.vmem [#allocation3], %s2659_s7 }
  0x88   : > { %234 = vrot.lane.b32.xlu1 %v232_v63, %s2805_s17 }
  0x89   : > { %399 = vrot.lane.b32.xlu0 %v397_v62, %s3945_s3 }
  0x8a   : > { %v902_v4 = vpop.permute.xlu1 %901 }
  0x8b   : > { %v882_v5 = vpop.permute.xlu0 %881  ;;  %v903_v6 = vrot.slane %v902_v4, 1 }
  0x8c   : > { %v883_v7 = vrot.slane %v882_v5, 1  ;;  %256 = vrot.lane.b32.xlu1 %v254_v3, %s3947_s5  ;;  %v221_v3 = vld [vmem:[%s2898_s25] ss:$4 sm:$0xf] }
  0x8d   : > { %245 = vrot.lane.b32.xlu0 %v243_v0, %s3946_s4  ;;  %v904_v8 = vsel %vm3921_vm1, %v902_v4, %v903_v6 }
  0x8e   : > { %v884_v9 = vsel %vm3924_vm2, %v882_v5, %v883_v7  ;;  %907 = vst.msk [vmem:[#allocation2 + $0xda] ss:$8 sm:$0x7] %vm2884_vm0, %v904_v8  ;;  %v802_v13 = vpop.permute.xlu1 %801 }
  0x8f   : > { %887 = vst.msk [vmem:[#allocation2 + $0xd8] ss:$8 sm:$0x7] %vm2884_vm0, %v884_v9  ;;  %v892_v12 = vpop.permute.xlu0 %891  ;;  %v803_v15 = vrot.slane %v802_v13, 1 }
  0x90   : > { %v893_v14 = vrot.slane %v892_v12, 1  ;;  %278 = vrot.lane.b32.xlu1 %v276_v11, %s2809_s24 }
  0x91   : > { %267 = vrot.lane.b32.xlu0 %v265_v10, %s2808_s23  ;;  %v804_v17 = vsel %vm3915_vm4, %v802_v13, %v803_v15  ;;  %vm3918_vm4 = vcmask 646144  }
  0x92   : > { %v894_v16 = vsel %vm3919_vm3, %v892_v12, %v893_v14  ;;  %807 = vst.msk [vmem:[#allocation2 + $0xc0] ss:$8 sm:$0x7] %vm2884_vm0, %v804_v17  ;;  %v822_v21 = vpop.permute.xlu1 %821 }
  0x93   : > { %897 = vst.msk [vmem:[#allocation2 + $0xd9] ss:$8 sm:$0x7] %vm2884_vm0, %v894_v16  ;;  %v812_v20 = vpop.permute.xlu0 %811  ;;  %v823_v23 = vrot.slane %v822_v21, 1 }
  0x94   : > { %v813_v22 = vrot.slane %v812_v20, 1  ;;  %300 = vrot.lane.b32.xlu1 %v298_v19, %s3940_s16  ;;  %s2327_s16 = sshll.u32 %s3838_s8, 4  ;;  %s3846_s16 = int_to_ptr.vmem [resolvable:$true] %s2327_s16 }
  0x95   : > { %289 = vrot.lane.b32.xlu0 %v287_v18, %s3941_s30  ;;  %v824_v25 = vsel %vm325_vm6, %v822_v21, %v823_v23  ;;  %s2728_s24 = scalar_lea.vmem %s3846_s16, 768 }
  0x96   : > { %v814_v24 = vsel %vm3923_vm5, %v812_v20, %v813_v22  ;;  %827 = vst.msk [vmem:[#allocation2 + $0xc2] ss:$8 sm:$0x7] %vm2884_vm0, %v824_v25  ;;  %v842_v29 = vpop.permute.xlu1 %841  ;;  %p2729_p11 = scmp.ne.s32.totalorder %s3846_s16, %s2728_s24 }
  0x97   : > { %817 = vst.msk [vmem:[#allocation2 + $0xc1] ss:$8 sm:$0x7] %vm2884_vm0, %v814_v24  ;;  %v832_v28 = vpop.permute.xlu0 %831  ;;  %v843_v31 = vrot.slane %v842_v29, 1 }
  0x98   : > { %v833_v30 = vrot.slane %v832_v28, 1  ;;  %157 = vrot.lane.b32.xlu1 %v155_v27, %s3942_s22  ;;  %p2730_p12 = pnand %p2729_p11, %p2872_p5 }
  0x99   : > { %311 = vrot.lane.b32.xlu0 %v309_v26, %s3948_s27  ;;  %v844_v34 = vsel %vm347_vm8, %v842_v29, %v843_v31 }
  0x9a   : > { %v834_v33 = vsel %vm336_vm7, %v832_v28, %v833_v30  ;;  %v939_v35 = vld [vmem:[#allocation2 + $0xe0] sm:$0xff]  ;;  %v938_v37 = vld [vmem:[#allocation2 + $0xd8] sm:$0xff]  ;;  %847 = vst.msk [vmem:[#allocation2 + $0xc4] ss:$8 sm:$0x7] %vm2884_vm0, %v844_v34  ;;  %v862_v39 = vpop.permute.xlu1 %861  ;;  %p2731_p13 = pneg %p2730_p12 }
  0x9b   : > { %837 = vst.msk [vmem:[#allocation2 + $0xc3] ss:$8 sm:$0x7] %vm2884_vm0, %v834_v33  ;;  %v852_v38 = vpop.permute.xlu0 %851  ;;  %v3064_v40 = vand.u32 4294901760, %v939_v35  ;;  %v3066_v41 = vand.u32 4294901760, %v938_v37  ;;  %v863_v44 = vrot.slane %v862_v39, 1 }
  0x9c   : > { %v853_v43 = vrot.slane %v852_v38, 1  ;;  %179 = vrot.lane.b32.xlu1 %v177_v36, %s2813_s28 }
  0x9d   : > { %960 = vmatprep.subr.mxu0 %v3064_v40  ;;  %168 = vrot.lane.b32.xlu0 %v166_v32, %s2812_s14  ;;  %v3074_v45 = vsub.f32 %v939_v35, %v3064_v40  ;;  %v3077_v46 = vsub.f32 %v938_v37, %v3066_v41  ;;  %v864_v48 = vsel %vm369_vm10, %v862_v39, %v863_v44  ;;  %s2660_s14 = smul.u32 768, %s2855_s13  ;;  %s3857_s13 = scalar_lea.sflag [#allocation4], %s134_s6 }
  0x9e   : > { %v854_v47 = vsel %vm358_vm9, %v852_v38, %v853_v43  ;;  %962 = vmatpush1.msra.mxu0 %v3066_v41  ;;  %867 = vst.msk [vmem:[#allocation2 + $0xc6] ss:$8 sm:$0x7] %vm2884_vm0, %v864_v48  ;;  %v722_v51 = vpop.permute.xlu1 %721 }
  0x9f   : > { %857 = vst.msk [vmem:[#allocation2 + $0xc5] ss:$8 sm:$0x7] %vm2884_vm0, %v854_v47  ;;  %v872_v50 = vpop.permute.xlu0 %871  ;;  %v1068_v53 = vand.u32 4294901760, %v3074_v45  ;;  %v1074_v54 = vand.u32 4294901760, %v3077_v46  ;;  %v723_v56 = vrot.slane %v722_v51, 1  ;;  %s3851_s23 = scalar_lea.hbm %s3899_s2, %s2660_s14 }
  0xa0   : > { %v873_v55 = vrot.slane %v872_v50, 1  ;;  %201 = vrot.lane.b32.xlu1 %v199_v52, %s2815_s29 }
  0xa1   : > { %190 = vrot.lane.b32.xlu0 %v188_v49, %s2814_s26  ;;  %v1069_v57 = vsub.f32 %v3074_v45, %v1068_v53  ;;  %v1075_v58 = vsub.f32 %v3077_v46, %v1074_v54  ;;  %v724_v60 = vsel %vm3914_vm12, %v722_v51, %v723_v56  ;;  %s3949_s26 = smov 102   ;;  %vm3926_vm12 = vcmask 654336  }
  0xa2   : > { %v874_v59 = vsel %vm380_vm11, %v872_v50, %v873_v55  ;;  %727 = vst.msk [vmem:[#allocation2 + $0xa8] ss:$8 sm:$0x7] %vm2884_vm0, %v724_v60  ;;  %v742_v63 = vpop.permute.xlu1 %741 }
  0xa3   : > { %877 = vst.msk [vmem:[#allocation2 + $0xc7] ss:$8 sm:$0x7] %vm2884_vm0, %v874_v59  ;;  %v732_v62 = vpop.permute.xlu0 %731  ;;  %v1070_v0 = vand.u32 4294901760, %v1069_v57  ;;  %v1076_v4 = vand.u32 4294901760, %v1075_v58  ;;  %v743_v6 = vrot.slane %v742_v63, 1 }
  0xa4   : > { %v733_v5 = vrot.slane %v732_v62, 1  ;;  %223 = vrot.lane.b32.xlu1 %v221_v3, %s3949_s26 }
  0xa5   : > { %1071 = vmatprep.subr.mxu1 %v1070_v0  ;;  %212 = vrot.lane.b32.xlu0 %v210_v61, %s3944_s21  ;;  %v744_v8 = vsel %vm237_vm14, %v742_v63, %v743_v6  ;;  %s2816_s21 = smov [#allocation3]  }
  0xa6   : > { %v734_v7 = vsel %vm3916_vm13, %v732_v62, %v733_v5  ;;  %1077 = vmatpush1.msra.mxu1 %v1076_v4  ;;  %747 = vst.msk [vmem:[#allocation2 + $0xaa] ss:$8 sm:$0x7] %vm2884_vm0, %v744_v8  ;;  %v762_v10 = vpop.permute.xlu1 %761  ;;  %vm3925_vm13 = vcmask 637952   ;;  %s2732_s3 = sshll.u32 %s2816_s21, 4  ;;  %s2733_s3 = int_to_ptr.vmem [resolvable:$false] %s2732_s3 }
  0xa7   : > { %737 = vst.msk [vmem:[#allocation2 + $0xa9] ss:$8 sm:$0x7] %vm2884_vm0, %v734_v7  ;;  %v752_v9 = vpop.permute.xlu0 %751  ;;  %v763_v12 = vrot.slane %v762_v10, 1  ;;  %s2734_s4 = scalar_lea.vmem %s2733_s3, 1536  ;;  %p2735_p0 = scmp.lt.s32.totalorder %s3846_s16, %s2733_s3 }
  0xa8   : > { %v753_v11 = vrot.slane %v752_v9, 1  ;;  %p2736_p1 = scmp.lt.s32.totalorder %s2734_s4, %s2728_s24 }
  0xa9   : > { %v764_v14 = vsel %vm3926_vm12, %v762_v10, %v763_v12 }
  0xaa   : > { %v754_v13 = vsel %vm3917_vm15, %v752_v9, %v753_v11  ;;  %v936_v15 = vld [vmem:[#allocation2 + $0xc8] sm:$0xff]  ;;  %v935_v16 = vld [vmem:[#allocation2 + $0xc0] sm:$0xff]  ;;  %767 = vst.msk [vmem:[#allocation2 + $0xac] ss:$8 sm:$0x7] %vm2884_vm0, %v764_v14  ;;  %v782_v18 = vpop.permute.xlu1 %781  ;;  %vm3920_vm15 = vcmask 629760   ;;  %p2737_p2 = por %p2736_p1, %p2735_p0 }
  0xab   : > { %757 = vst.msk [vmem:[#allocation2 + $0xab] ss:$8 sm:$0x7] %vm2884_vm0, %v754_v13  ;;  %v772_v17 = vpop.permute.xlu0 %771  ;;  %v3121_v19 = vand.u32 4294901760, %v936_v15  ;;  %v3123_v20 = vand.u32 4294901760, %v935_v16  ;;  %v783_v22 = vrot.slane %v782_v18, 1 }
  0xac   : > { %v773_v21 = vrot.slane %v772_v17, 1  ;;  %p2738_p3 = pnand %p2737_p2, %p2731_p13 }
  0xad   : > { %964 = vmatprep.subr.mxu0 %v3121_v19  ;;  %v3127_v23 = vsub.f32 %v936_v15, %v3121_v19  ;;  %v3130_v24 = vsub.f32 %v935_v16, %v3123_v20  ;;  %v784_v26 = vsel %vm3925_vm13, %v782_v18, %v783_v22 }
  0xae   : > { %v774_v25 = vsel %vm3918_vm4, %v772_v17, %v773_v21  ;;  %966 = vmatpush1.msra.mxu0 %v3123_v20  ;;  %787 = vst.msk [vmem:[#allocation2 + $0xae] ss:$8 sm:$0x7] %vm2884_vm0, %v784_v26  ;;  %v647_v28 = vpop.permute.xlu1 %646  ;;  %vm3922_vm4 = vcmask 1039360  }
  0xaf   : > { %777 = vst.msk [vmem:[#allocation2 + $0xad] ss:$8 sm:$0x7] %vm2884_vm0, %v774_v25  ;;  %v792_v27 = vpop.permute.xlu0 %791  ;;  %v1080_v29 = vand.u32 4294901760, %v3127_v23  ;;  %v1086_v30 = vand.u32 4294901760, %v3130_v24  ;;  %v648_v32 = vrot.slane %v647_v28, 1 }
  0xb0   : > { %v793_v31 = vrot.slane %v792_v27, 1 }
  0xb1   : > { %v1081_v33 = vsub.f32 %v3127_v23, %v1080_v29  ;;  %v1087_v34 = vsub.f32 %v3130_v24, %v1086_v30  ;;  %v649_v36 = vsel %vm3919_vm3, %v647_v28, %v648_v32  ;;  %vm171_vm3 = vcmask 1031168  }
  0xb2   : > { %v794_v35 = vsel %vm3920_vm15, %v792_v27, %v793_v31  ;;  %652 = vst.msk [vmem:[#allocation2 + $0x90] ss:$8 sm:$0x7] %vm2884_vm0, %v649_v36  ;;  %v672_v38 = vpop.permute.xlu1 %671  ;;  %vm182_vm15 = vcmask 1022976  }
  0xb3   : > { %797 = vst.msk [vmem:[#allocation2 + $0xaf] ss:$8 sm:$0x7] %vm2884_vm0, %v794_v35  ;;  %v657_v37 = vpop.permute.xlu0 %656  ;;  %v1082_v39 = vand.u32 4294901760, %v1081_v33  ;;  %v1088_v42 = vand.u32 4294901760, %v1087_v34  ;;  %v673_v44 = vrot.slane %v672_v38, 1 }
  0xb4   : > { %v658_v43 = vrot.slane %v657_v37, 1 }
  0xb5   : > { %1083 = vmatprep.subr.mxu1 %v1082_v39  ;;  %v674_v48 = vsel %vm3922_vm4, %v672_v38, %v673_v44  ;;  %vm204_vm4 = vcmask 850944  }
  0xb6   : > { %v659_v47 = vsel %vm3921_vm1, %v657_v37, %v658_v43  ;;  %1089 = vmatpush1.msra.mxu1 %v1088_v42  ;;  %677 = vst.msk [vmem:[#allocation2 + $0x93] ss:$8 sm:$0x7] %vm2884_vm0, %v674_v48  ;;  %v692_v50 = vpop.permute.xlu1 %691  ;;  %vm193_vm1 = vcmask 1014784  }
  0xb7   : > { %662 = vst.msk [vmem:[#allocation2 + $0x91] ss:$8 sm:$0x7] %vm2884_vm0, %v659_v47  ;;  %v682_v49 = vpop.permute.xlu0 %681  ;;  %v693_v52 = vrot.slane %v692_v50, 1 }
  0xb8   : > { %v683_v51 = vrot.slane %v682_v49, 1 }
  0xb9   : > { %v694_v56 = vsel %vm182_vm15, %v692_v50, %v693_v52 }
  0xba   : > { %v684_v55 = vsel %vm171_vm3, %v682_v49, %v683_v51  ;;  %v933_v57 = vld [vmem:[#allocation2 + $0xb0] sm:$0xff]  ;;  %v932_v58 = vld [vmem:[#allocation2 + $0xa8] sm:$0xff]  ;;  %697 = vst.msk [vmem:[#allocation2 + $0x95] ss:$8 sm:$0x7] %vm2884_vm0, %v694_v56  ;;  %v712_v60 = vpop.permute.xlu1 %711 }
  0xbb   : > { %687 = vst.msk [vmem:[#allocation2 + $0x94] ss:$8 sm:$0x7] %vm2884_vm0, %v684_v55  ;;  %v702_v59 = vpop.permute.xlu0 %701  ;;  %v3165_v61 = vand.u32 4294901760, %v933_v57  ;;  %v3167_v62 = vand.u32 4294901760, %v932_v58  ;;  %v713_v0 = vrot.slane %v712_v60, 1 }
  0xbc   : > { %v703_v63 = vrot.slane %v702_v59, 1 }
  0xbd   : > { %968 = vmatprep.subr.mxu0 %v3165_v61  ;;  %v3171_v3 = vsub.f32 %v933_v57, %v3165_v61  ;;  %v3174_v4 = vsub.f32 %v932_v58, %v3167_v62  ;;  %v714_v6 = vsel %vm204_vm4, %v712_v60, %v713_v0 }
  0xbe   : > { %v704_v5 = vsel %vm193_vm1, %v702_v59, %v703_v63  ;;  %970 = vmatpush1.msra.mxu0 %v3167_v62  ;;  %717 = vst.msk [vmem:[#allocation2 + $0x97] ss:$8 sm:$0x7] %vm2884_vm0, %v714_v6  ;;  %v577_v7 = vpop.permute.xlu1 %576 }
  0xbf   : > { %707 = vst.msk [vmem:[#allocation2 + $0x96] ss:$8 sm:$0x7] %vm2884_vm0, %v704_v5  ;;  %v567_v8 = vpop.permute.xlu0 %566  ;;  %v1092_v9 = vand.u32 4294901760, %v3171_v3  ;;  %v1098_v10 = vand.u32 4294901760, %v3174_v4  ;;  %v578_v11 = vrot.slane %v577_v7, 1 }
  0xc0   : > { %v568_v12 = vrot.slane %v567_v8, 1 }
  0xc1   : > { %v1093_v13 = vsub.f32 %v3171_v3, %v1092_v9  ;;  %v1099_v14 = vsub.f32 %v3174_v4, %v1098_v10  ;;  %v579_v15 = vsel %vm325_vm6, %v577_v7, %v578_v11 }
  0xc2   : > { %v569_v16 = vsel %vm3923_vm5, %v567_v8, %v568_v12  ;;  %582 = vst.msk [vmem:[#allocation2 + $0x79] ss:$8 sm:$0x7] %vm2884_vm0, %v579_v15  ;;  %v597_v17 = vpop.permute.xlu1 %596  ;;  %vm3950_vm5 = vcmask 834560  }
  0xc3   : > { %572 = vst.msk [vmem:[#allocation2 + $0x78] ss:$8 sm:$0x7] %vm2884_vm0, %v569_v16  ;;  %v587_v18 = vpop.permute.xlu0 %586  ;;  %v1094_v21 = vand.u32 4294901760, %v1093_v13  ;;  %v1100_v22 = vand.u32 4294901760, %v1099_v14  ;;  %v598_v25 = vrot.slane %v597_v17, 1 }
  0xc4   : > { %v588_v26 = vrot.slane %v587_v18, 1 }
  0xc5   : > { %1095 = vmatprep.subr.mxu1 %v1094_v21  ;;  %v599_v27 = vsel %vm347_vm8, %v597_v17, %v598_v25 }
  0xc6   : > { %v589_v28 = vsel %vm336_vm7, %v587_v18, %v588_v26  ;;  %1101 = vmatpush1.msra.mxu1 %v1100_v22  ;;  %v930_v31 = vld [vmem:[#allocation2 + $0x98] sm:$0xff]  ;;  %v929_v32 = vld [vmem:[#allocation2 + $0x90] sm:$0xff]  ;;  %602 = vst.msk [vmem:[#allocation2 + $0x7b] ss:$8 sm:$0x7] %vm2884_vm0, %v599_v27  ;;  %v617_v33 = vpop.permute.xlu1 %616 }
  0xc7   : > { %592 = vst.msk [vmem:[#allocation2 + $0x7a] ss:$8 sm:$0x7] %vm2884_vm0, %v589_v28  ;;  %v607_v34 = vpop.permute.xlu0 %606  ;;  %v3203_v35 = vand.u32 4294901760, %v930_v31  ;;  %v3205_v36 = vand.u32 4294901760, %v929_v32  ;;  %v618_v37 = vrot.slane %v617_v33, 1 }
  0xc8   : > { %v608_v38 = vrot.slane %v607_v34, 1 }
  0xc9   : > { %972 = vmatprep.subr.mxu0 %v3203_v35  ;;  %v3209_v39 = vsub.f32 %v930_v31, %v3203_v35  ;;  %v3212_v42 = vsub.f32 %v929_v32, %v3205_v36  ;;  %v619_v43 = vsel %vm369_vm10, %v617_v33, %v618_v37 }
  0xca   : > { %v609_v44 = vsel %vm358_vm9, %v607_v34, %v608_v38  ;;  %974 = vmatpush1.msra.mxu0 %v3205_v36  ;;  %622 = vst.msk [vmem:[#allocation2 + $0x7d] ss:$8 sm:$0x7] %vm2884_vm0, %v619_v43  ;;  %v637_v47 = vpop.permute.xlu1 %636 }
  0xcb   : > { %612 = vst.msk [vmem:[#allocation2 + $0x7c] ss:$8 sm:$0x7] %vm2884_vm0, %v609_v44  ;;  %v627_v48 = vpop.permute.xlu0 %626  ;;  %v1104_v49 = vand.u32 4294901760, %v3209_v39  ;;  %v1110_v50 = vand.u32 4294901760, %v3212_v42  ;;  %v638_v51 = vrot.slane %v637_v47, 1 }
  0xcc   : > { %v628_v52 = vrot.slane %v627_v48, 1 }
  0xcd   : > { %v1105_v55 = vsub.f32 %v3209_v39, %v1104_v49  ;;  %v1111_v56 = vsub.f32 %v3212_v42, %v1110_v50  ;;  %v639_v57 = vsel %vm3924_vm2, %v637_v47, %v638_v51  ;;  %vm3951_vm2 = vcmask 818176  }
  0xce   : > { %v629_v58 = vsel %vm380_vm11, %v627_v48, %v628_v52  ;;  %642 = vst.msk [vmem:[#allocation2 + $0x7f] ss:$8 sm:$0x7] %vm2884_vm0, %v639_v57  ;;  %v497_v59 = vpop.permute.xlu1 %496 }
  0xcf   : > { %632 = vst.msk [vmem:[#allocation2 + $0x7e] ss:$8 sm:$0x7] %vm2884_vm0, %v629_v58  ;;  %v487_v60 = vpop.permute.xlu0 %486  ;;  %v1106_v63 = vand.u32 4294901760, %v1105_v55  ;;  %v1112_v0 = vand.u32 4294901760, %v1111_v56  ;;  %v498_v5 = vrot.slane %v497_v59, 1 }
  0xd0   : > { %v488_v6 = vrot.slane %v487_v60, 1 }
  0xd1   : > { %1107 = vmatprep.subr.mxu1 %v1106_v63  ;;  %v499_v7 = vsel %vm237_vm14, %v497_v59, %v498_v5 }
  0xd2   : > { %v489_v8 = vsel %vm3950_vm5, %v487_v60, %v488_v6  ;;  %1113 = vmatpush1.msra.mxu1 %v1112_v0  ;;  %502 = vst.msk [vmem:[#allocation2 + $0x61] ss:$8 sm:$0x7] %vm2884_vm0, %v499_v7  ;;  %v517_v11 = vpop.permute.xlu1 %516  ;;  %vm3953_vm5 = vcmask 621568  }
  0xd3   : > { %492 = vst.msk [vmem:[#allocation2 + $0x60] ss:$8 sm:$0x7] %vm2884_vm0, %v489_v8  ;;  %v507_v12 = vpop.permute.xlu0 %506  ;;  %v518_v13 = vrot.slane %v517_v11, 1 }
  0xd4   : > { %v508_v14 = vrot.slane %v507_v12, 1 }
  0xd5   : > { %v519_v15 = vsel %vm3926_vm12, %v517_v11, %v518_v13  ;;  %vm3956_vm12 = vcmask 228352  }
  0xd6   : > { %v509_v16 = vsel %vm3951_vm2, %v507_v12, %v508_v14  ;;  %v927_v17 = vld [vmem:[#allocation2 + $0x80] sm:$0xff]  ;;  %v926_v18 = vld [vmem:[#allocation2 + $0x78] sm:$0xff]  ;;  %522 = vst.msk [vmem:[#allocation2 + $0x63] ss:$8 sm:$0x7] %vm2884_vm0, %v519_v15  ;;  %v537_v21 = vpop.permute.xlu1 %536  ;;  %vm3952_vm2 = vcmask 646144  }
  0xd7   : > { %512 = vst.msk [vmem:[#allocation2 + $0x62] ss:$8 sm:$0x7] %vm2884_vm0, %v509_v16  ;;  %v527_v22 = vpop.permute.xlu0 %526  ;;  %v3247_v25 = vand.u32 4294901760, %v927_v17  ;;  %v3249_v26 = vand.u32 4294901760, %v926_v18  ;;  %v538_v27 = vrot.slane %v537_v21, 1 }
  0xd8   : > { %v528_v28 = vrot.slane %v527_v22, 1 }
  0xd9   : > { %976 = vmatprep.subr.mxu0 %v3247_v25  ;;  %v3253_v31 = vsub.f32 %v927_v17, %v3247_v25  ;;  %v3256_v32 = vsub.f32 %v926_v18, %v3249_v26  ;;  %v539_v33 = vsel %vm3925_vm13, %v537_v21, %v538_v27  ;;  %vm3955_vm13 = vcmask 1039360  }
  0xda   : > { %v529_v34 = vsel %vm3952_vm2, %v527_v22, %v528_v28  ;;  %978 = vmatpush1.msra.mxu0 %v3249_v26  ;;  %542 = vst.msk [vmem:[#allocation2 + $0x65] ss:$8 sm:$0x7] %vm2884_vm0, %v539_v33  ;;  %v557_v37 = vpop.permute.xlu1 %556  ;;  %vm3954_vm2 = vcmask 629760  }
  0xdb   : > { %532 = vst.msk [vmem:[#allocation2 + $0x64] ss:$8 sm:$0x7] %vm2884_vm0, %v529_v34  ;;  %v547_v38 = vpop.permute.xlu0 %546  ;;  %v1116_v43 = vand.u32 4294901760, %v3253_v31  ;;  %v3935_v44 = vand.u32 4294901760, %v3256_v32  ;;  %v558_v47 = vrot.slane %v557_v37, 1 }
  0xdc   : > { %v548_v48 = vrot.slane %v547_v38, 1 }
  0xdd   : > { %v1117_v51 = vsub.f32 %v3253_v31, %v1116_v43  ;;  %v1123_v52 = vsub.f32 %v3256_v32, %v3935_v44  ;;  %v559_v55 = vsel %vm3953_vm5, %v557_v37, %v558_v47 }
  0xde   : > { %v549_v56 = vsel %vm3954_vm2, %v547_v38, %v548_v48  ;;  %562 = vst.msk [vmem:[#allocation2 + $0x67] ss:$8 sm:$0x7] %vm2884_vm0, %v559_v55  ;;  %v427_v57 = vpop.permute.xlu1 %426 }
  0xdf   : > { %552 = vst.msk [vmem:[#allocation2 + $0x66] ss:$8 sm:$0x7] %vm2884_vm0, %v549_v56  ;;  %v411_v58 = vpop.permute.xlu0 %410  ;;  %v1118_v59 = vand.u32 4294901760, %v1117_v51  ;;  %v1124_v60 = vand.u32 4294901760, %v1123_v52  ;;  %v428_v63 = vrot.slane %v427_v57, 1 }
  0xe0   : > { %v412_v0 = vrot.slane %v411_v58, 1 }
  0xe1   : > { %1119 = vmatprep.subr.mxu1 %v1118_v59  ;;  %v429_v5 = vsel %vm3955_vm13, %v427_v57, %v428_v63  ;;  %vm3964_vm13 = vmmov %vm3954_vm2  ;;  %vm3967_vm2 = vcmask 1039360  }
  0xe2   : > { %v414_v6 = vsel %vm3956_vm12, %v411_v58, %v412_v0  ;;  %1125 = vmatpush1.msra.mxu1 %v1124_v60  ;;  %432 = vst.msk [vmem:[#allocation2 + $0x4a] ss:$8 sm:$0x7] %vm2884_vm0, %v429_v5  ;;  %v447_v7 = vpop.permute.xlu1 %446  ;;  %vm3957_vm12 = vcmask 842752  }
  0xe3   : > { %417 = vst.msk [vmem:[#allocation2 + $0x48] ss:$8 sm:$0x7] %vm2884_vm0, %v414_v6  ;;  %v437_v8 = vpop.permute.xlu0 %436  ;;  %v448_v11 = vrot.slane %v447_v7, 1 }
  0xe4   : > { %v438_v12 = vrot.slane %v437_v8, 1 }
  0xe5   : > { %v449_v13 = vsel %vm182_vm15, %v447_v7, %v448_v11 }
  0xe6   : > { %v439_v14 = vsel %vm171_vm3, %v437_v8, %v438_v12  ;;  %v924_v15 = vld [vmem:[#allocation2 + $0x68] sm:$0xff]  ;;  %v923_v16 = vld [vmem:[#allocation2 + $0x60] sm:$0xff]  ;;  %452 = vst.msk [vmem:[#allocation2 + $0x4c] ss:$8 sm:$0x7] %vm2884_vm0, %v449_v13  ;;  %v467_v17 = vpop.permute.xlu1 %466 }
  0xe7   : > { %442 = vst.msk [vmem:[#allocation2 + $0x4b] ss:$8 sm:$0x7] %vm2884_vm0, %v439_v14  ;;  %v457_v18 = vpop.permute.xlu0 %456  ;;  %v3291_v21 = vand.u32 4294901760, %v924_v15  ;;  %v3293_v22 = vand.u32 4294901760, %v923_v16  ;;  %v468_v27 = vrot.slane %v467_v17, 1 }
  0xe8   : > { %v458_v28 = vrot.slane %v457_v18, 1 }
  0xe9   : > { %980 = vmatprep.subr.mxu0 %v3291_v21  ;;  %v3297_v33 = vsub.f32 %v924_v15, %v3291_v21  ;;  %v3300_v34 = vsub.f32 %v923_v16, %v3293_v22  ;;  %v469_v37 = vsel %vm204_vm4, %v467_v17, %v468_v27 }
  0xea   : > { %v459_v38 = vsel %vm193_vm1, %v457_v18, %v458_v28  ;;  %982 = vmatpush1.msra.mxu0 %v3293_v22  ;;  %472 = vst.msk [vmem:[#allocation2 + $0x4e] ss:$8 sm:$0x7] %vm2884_vm0, %v469_v37  ;;  %v323_v48 = vpop.permute.xlu1 %322 }
  0xeb   : > { %462 = vst.msk [vmem:[#allocation2 + $0x4d] ss:$8 sm:$0x7] %vm2884_vm0, %v459_v38  ;;  %v477_v47 = vpop.permute.xlu0 %476  ;;  %v3932_v51 = vand.u32 4294901760, %v3297_v33  ;;  %v3931_v52 = vand.u32 4294901760, %v3300_v34  ;;  %v324_v56 = vrot.slane %v323_v48, 1 }
  0xec   : > { %v478_v55 = vrot.slane %v477_v47, 1 }
  0xed   : > { %v1129_v57 = vsub.f32 %v3297_v33, %v3932_v51  ;;  %v1135_v58 = vsub.f32 %v3300_v34, %v3931_v52  ;;  %v326_v60 = vsel %vm325_vm6, %v323_v48, %v324_v56  ;;  %vm3958_vm6 = vcmask 244736  }
  0xee   : > { %v479_v59 = vsel %vm3957_vm12, %v477_v47, %v478_v55  ;;  %329 = vst.msk [vmem:[#allocation2 + $0x30] ss:$8 sm:$0x7] %vm2884_vm0, %v326_v60  ;;  %v345_v0 = vpop.permute.xlu1 %344 }
  0xef   : > { %482 = vst.msk [vmem:[#allocation2 + $0x4f] ss:$8 sm:$0x7] %vm2884_vm0, %v479_v59  ;;  %v334_v63 = vpop.permute.xlu0 %333  ;;  %v1130_v5 = vand.u32 4294901760, %v1129_v57  ;;  %v1136_v6 = vand.u32 4294901760, %v1135_v58  ;;  %v346_v8 = vrot.slane %v345_v0, 1 }
  0xf0   : > { %v335_v7 = vrot.slane %v334_v63, 1 }
  0xf1   : > { %1131 = vmatprep.subr.mxu1 %v1130_v5  ;;  %v348_v12 = vsel %vm347_vm8, %v345_v0, %v346_v8  ;;  %vm3960_vm8 = vcmask 818176  }
  0xf2   : > { %v337_v11 = vsel %vm336_vm7, %v334_v63, %v335_v7  ;;  %1137 = vmatpush1.msra.mxu1 %v1136_v6  ;;  %351 = vst.msk [vmem:[#allocation2 + $0x32] ss:$8 sm:$0x7] %vm2884_vm0, %v348_v12  ;;  %v367_v14 = vpop.permute.xlu1 %366  ;;  %vm3959_vm7 = vcmask 236544  }
  0xf3   : > { %340 = vst.msk [vmem:[#allocation2 + $0x31] ss:$8 sm:$0x7] %vm2884_vm0, %v337_v11  ;;  %v356_v13 = vpop.permute.xlu0 %355  ;;  %v368_v16 = vrot.slane %v367_v14, 1 }
  0xf4   : > { %v357_v15 = vrot.slane %v356_v13, 1 }
  0xf5   : > { %v370_v18 = vsel %vm369_vm10, %v367_v14, %v368_v16  ;;  %vm3962_vm10 = vcmask 646144  }
  0xf6   : > { %v359_v17 = vsel %vm358_vm9, %v356_v13, %v357_v15  ;;  %v921_v27 = vld [vmem:[#allocation2 + $0x50] sm:$0xff]  ;;  %v920_v28 = vld [vmem:[#allocation2 + $0x48] sm:$0xff]  ;;  %373 = vst.msk [vmem:[#allocation2 + $0x34] ss:$8 sm:$0x7] %vm2884_vm0, %v370_v18  ;;  %v389_v38 = vpop.permute.xlu1 %388  ;;  %vm3961_vm9 = vcmask 654336  }
  0xf7   : > { %362 = vst.msk [vmem:[#allocation2 + $0x33] ss:$8 sm:$0x7] %vm2884_vm0, %v359_v17  ;;  %v378_v37 = vpop.permute.xlu0 %377  ;;  %v3335_v47 = vand.u32 4294901760, %v921_v27  ;;  %v3337_v48 = vand.u32 4294901760, %v920_v28  ;;  %v390_v56 = vrot.slane %v389_v38, 1  ;;  %vm3968_vm12 = vmmov %vm3961_vm9 }
  0xf8   : > { %v379_v55 = vrot.slane %v378_v37, 1 }
  0xf9   : > { %984 = vmatprep.subr.mxu0 %v3335_v47  ;;  %v3341_v57 = vsub.f32 %v921_v27, %v3335_v47  ;;  %v3344_v58 = vsub.f32 %v920_v28, %v3337_v48  ;;  %v392_v60 = vsel %vm3958_vm6, %v389_v38, %v390_v56 }
  0xfa   : > { %v381_v59 = vsel %vm380_vm11, %v378_v37, %v379_v55  ;;  %986 = vmatpush1.msra.mxu0 %v3337_v48  ;;  %395 = vst.msk [vmem:[#allocation2 + $0x36] ss:$8 sm:$0x7] %vm2884_vm0, %v392_v60  ;;  %v235_v0 = vpop.permute.xlu1 %234  ;;  %vm3963_vm11 = vcmask 637952  }
  0xfb   : > { %384 = vst.msk [vmem:[#allocation2 + $0x35] ss:$8 sm:$0x7] %vm2884_vm0, %v381_v59  ;;  %v400_v63 = vpop.permute.xlu0 %399  ;;  %v3930_v5 = vand.u32 4294901760, %v3341_v57  ;;  %v3929_v6 = vand.u32 4294901760, %v3344_v58  ;;  %v236_v8 = vrot.slane %v235_v0, 1 }
  0xfc   : > { %v401_v7 = vrot.slane %v400_v63, 1 }
  0xfd   : > { %v1141_v11 = vsub.f32 %v3341_v57, %v3930_v5  ;;  %v1147_v12 = vsub.f32 %v3344_v58, %v3929_v6  ;;  %v238_v14 = vsel %vm237_vm14, %v235_v0, %v236_v8  ;;  %vm3965_vm14 = vmmov %vm3953_vm5  ;;  %vm3966_vm5 = vcmask 457728  }
  0xfe   : > { %v403_v13 = vsel %vm3959_vm7, %v400_v63, %v401_v7  ;;  %241 = vst.msk [vmem:[#allocation2 + $0x18] ss:$8 sm:$0x7] %vm2884_vm0, %v238_v14  ;;  %v257_v16 = vpop.permute.xlu1 %256 }
  0xff   : > { %406 = vst.msk [vmem:[#allocation2 + $0x37] ss:$8 sm:$0x7] %vm2884_vm0, %v403_v13  ;;  %v246_v15 = vpop.permute.xlu0 %245  ;;  %v1142_v17 = vand.u32 4294901760, %v1141_v11  ;;  %v1148_v18 = vand.u32 4294901760, %v1147_v12  ;;  %v258_v28 = vrot.slane %v257_v16, 1 }
 0x100   : > { %v247_v27 = vrot.slane %v246_v15, 1 }
 0x101   : > { %1143 = vmatprep.subr.mxu1 %v1142_v17  ;;  %v260_v38 = vsel %vm3961_vm9, %v257_v16, %v258_v28 }
 0x102   : > { %v249_v37 = vsel %vm3960_vm8, %v246_v15, %v247_v27  ;;  %1149 = vmatpush1.msra.mxu1 %v1148_v18  ;;  %263 = vst.msk [vmem:[#allocation2 + $0x1a] ss:$8 sm:$0x7] %vm2884_vm0, %v260_v38  ;;  %v279_v56 = vpop.permute.xlu1 %278 }
 0x103   : > { %252 = vst.msk [vmem:[#allocation2 + $0x19] ss:$8 sm:$0x7] %vm2884_vm0, %v249_v37  ;;  %v268_v55 = vpop.permute.xlu0 %267  ;;  %v280_v60 = vrot.slane %v279_v56, 1 }
 0x104   : > { %v269_v59 = vrot.slane %v268_v55, 1 }
 0x105   : > { %v282_v0 = vsel %vm3963_vm11, %v279_v56, %v280_v60 }
 0x106   : > { %v271_v63 = vsel %vm3962_vm10, %v268_v55, %v269_v59  ;;  %v918_v7 = vld [vmem:[#allocation2 + $0x38] sm:$0xff]  ;;  %v917_v8 = vld [vmem:[#allocation2 + $0x30] sm:$0xff]  ;;  %285 = vst.msk [vmem:[#allocation2 + $0x1c] ss:$8 sm:$0x7] %vm2884_vm0, %v282_v0  ;;  %v301_v12 = vpop.permute.xlu1 %300 }
 0x107   : > { %274 = vst.msk [vmem:[#allocation2 + $0x1b] ss:$8 sm:$0x7] %vm2884_vm0, %v271_v63  ;;  %v290_v11 = vpop.permute.xlu0 %289  ;;  %v3379_v13 = vand.u32 4294901760, %v918_v7  ;;  %v3381_v14 = vand.u32 4294901760, %v917_v8  ;;  %v302_v16 = vrot.slane %v301_v12, 1 }
 0x108   : > { %v291_v15 = vrot.slane %v290_v11, 1 }
 0x109   : > { %988 = vmatprep.subr.mxu0 %v3379_v13  ;;  %v3385_v17 = vsub.f32 %v918_v7, %v3379_v13  ;;  %v3388_v18 = vsub.f32 %v917_v8, %v3381_v14  ;;  %v304_v28 = vsel %vm3965_vm14, %v301_v12, %v302_v16 }
 0x10a   : > { %v293_v27 = vsel %vm3964_vm13, %v290_v11, %v291_v15  ;;  %990 = vmatpush1.msra.mxu0 %v3381_v14  ;;  %307 = vst.msk [vmem:[#allocation2 + $0x1e] ss:$8 sm:$0x7] %vm2884_vm0, %v304_v28  ;;  %v158_v38 = vpop.permute.xlu1 %157  ;;  %v909_v11 = vld [vmem:[%s3897_s0] sm:$0xff] }
 0x10b   : > { %296 = vst.msk [vmem:[#allocation2 + $0x1d] ss:$8 sm:$0x7] %vm2884_vm0, %v293_v27  ;;  %v312_v37 = vpop.permute.xlu0 %311  ;;  %v3928_v55 = vand.u32 4294901760, %v3385_v17  ;;  %v3927_v56 = vand.u32 4294901760, %v3388_v18  ;;  %v159_v60 = vrot.slane %v158_v38, 1 }
 0x10c   : > { %v313_v59 = vrot.slane %v312_v37, 1 }
 0x10d   : > { %v1153_v63 = vsub.f32 %v3385_v17, %v3928_v55  ;;  %v1159_v0 = vsub.f32 %v3388_v18, %v3927_v56  ;;  %v161_v8 = vsel %vm3967_vm2, %v158_v38, %v159_v60 }
 0x10e   : > { %v315_v7 = vsel %vm3966_vm5, %v312_v37, %v313_v59  ;;  %164 = vst.msk [vmem:[#allocation2 + $0x1] ss:$8 sm:$0x7] %vm2884_vm0, %v161_v8  ;;  %v180_v28 = vpop.permute.xlu1 %179  ;;  %v942_v37 = vsel %vm3968_vm12, %v909_v11, 0  ;;  %v910_v59 = vld [vmem:[%s3897_s0 + $0x8] sm:$0xff] }
 0x10f   : > { %318 = vst.msk [vmem:[#allocation2 + $0x1f] ss:$8 sm:$0x7] %vm2884_vm0, %v315_v7  ;;  %v169_v12 = vpop.permute.xlu0 %168  ;;  %v1154_v15 = vand.u32 4294901760, %v1153_v63  ;;  %v1160_v16 = vand.u32 4294901760, %v1159_v0  ;;  %v181_v56 = vrot.slane %v180_v28, 1 }
 0x110   : > { %v170_v27 = vrot.slane %v169_v12, 1  ;;  %v3424_v8 = vand.u32 4294901760, %v942_v37 }
 0x111   : > { %1155 = vmatprep.subr.mxu1 %v1154_v15  ;;  %v183_v60 = vsel %vm182_vm15, %v180_v28, %v181_v56 }
 0x112   : > { %v172_v38 = vsel %vm171_vm3, %v169_v12, %v170_v27  ;;  %1161 = vmatpush1.msra.mxu1 %v1160_v16  ;;  %186 = vst.msk [vmem:[#allocation2 + $0x3] ss:$8 sm:$0x7] %vm2884_vm0, %v183_v60  ;;  %v202_v7 = vpop.permute.xlu1 %201  ;;  %vm3969_vm3 = vmmov %vm3961_vm9 }
 0x113   : > { %175 = vst.msk [vmem:[#allocation2 + $0x2] ss:$8 sm:$0x7] %vm2884_vm0, %v172_v38  ;;  %v191_v63 = vpop.permute.xlu0 %190  ;;  %v203_v11 = vrot.slane %v202_v7, 1  ;;  %v945_v12 = vsel %vm3969_vm3, %v910_v59, 0  ;;  %v3438_v59 = vsub.f32 %v942_v37, %v3424_v8 }
 0x114   : > { %v192_v0 = vrot.slane %v191_v63, 1 }
 0x115   : > { %v205_v56 = vsel %vm204_vm4, %v202_v7, %v203_v11  ;;  %vm3971_vm4 = vcmask 834560  }
 0x116   : > { %v194_v15 = vsel %vm193_vm1, %v191_v63, %v192_v0  ;;  %v915_v16 = vld [vmem:[#allocation2 + $0x20] sm:$0xff]  ;;  %v914_v27 = vld [vmem:[#allocation2 + $0x18] sm:$0xff]  ;;  %208 = vst.msk [vmem:[#allocation2 + $0x5] ss:$8 sm:$0x7] %vm2884_vm0, %v205_v56  ;;  %v224_v6 = vpop.permute.xlu1 %223  ;;  %v3440_v63 = vand.u32 4294901760, %v945_v12 }
 0x117   : > { %197 = vst.msk [vmem:[#allocation2 + $0x4] ss:$8 sm:$0x7] %vm2884_vm0, %v194_v15  ;;  %v213_v28 = vpop.permute.xlu0 %212  ;;  %v3431_v38 = vand.u32 4294901760, %v915_v16  ;;  %v3433_v60 = vand.u32 4294901760, %v914_v27  ;;  %v225_v0 = vrot.slane %v224_v6, 1 }
 0x118   : > { %v214_v55 = vrot.slane %v213_v28, 1  ;;  %vm3970_vm1 = vcmask 842752  }
 0x119   : > { %992 = vmatprep.subr.mxu0 %v3431_v38  ;;  %v3444_v7 = vsub.f32 %v915_v16, %v3431_v38  ;;  %v3447_v11 = vsub.f32 %v914_v27, %v3433_v60  ;;  %v227_v37 = vsel %vm3971_vm4, %v224_v6, %v225_v0  ;;  %v3459_v16 = vand.u32 4294901760, %v3438_v59 }
 0x11a   : > { %v216_v15 = vsel %vm3970_vm1, %v213_v28, %v214_v55  ;;  %994 = vmatpush1.msra.mxu0 %v3433_v60  ;;  %230 = vst.msk [vmem:[#allocation2 + $0x7] ss:$8 sm:$0x7] %vm2884_vm0, %v227_v37  ;;  %v3462_v27 = vsub.f32 %v945_v12, %v3440_v63 }
 0x11b   : > { %219 = vst.msk [vmem:[#allocation2 + $0x6] ss:$8 sm:$0x7] %vm2884_vm0, %v216_v15  ;;  %v3933_v56 = vand.u32 4294901760, %v3444_v7  ;;  %v3934_v5 = vand.u32 4294901760, %v3447_v11  ;;  %v1035_v1 = vsub.f32 %v3438_v59, %v3459_v16 }
 0x11c   : > { %v3473_v15 = vand.u32 4294901760, %v3462_v27 }
 0x11d   : > { %v1165_v55 = vsub.f32 %v3444_v7, %v3933_v56  ;;  %v1171_v6 = vsub.f32 %v3447_v11, %v3934_v5  ;;  %v3479_v56 = vand.u32 4294901760, %v1035_v1 }
 0x11f   : > { %v1166_v28 = vand.u32 4294901760, %v1165_v55  ;;  %v1172_v0 = vand.u32 4294901760, %v1171_v6  ;;  %v1046_v55 = vsub.f32 %v3462_v27, %v3473_v15 }
 0x121   : > { %1167 = vmatprep.subr.mxu1 %v1166_v28  ;;  %v3495_v1 = vand.u32 4294901760, %v1046_v55 }
 0x122   : > { %1173 = vmatpush1.msra.mxu1 %v1172_v0  ;;  %v912_v12 = vld [vmem:[#allocation2 + $0x8] sm:$0xff]  ;;  %v911_v37 = vld [vmem:[#allocation2] sm:$0xff] }
 0x123   : > { %v3475_v52 = vand.u32 4294901760, %v912_v12  ;;  %v3477_v51 = vand.u32 4294901760, %v911_v37 }
 0x125   : > { %996 = vmatprep.subr.mxu0 %v3475_v52  ;;  %v3485_v6 = vsub.f32 %v912_v12, %v3475_v52  ;;  %v3488_v5 = vsub.f32 %v911_v37, %v3477_v51 }
 0x126   : > { %998 = vmatpush1.msra.mxu0 %v3477_v51 }
 0x127   : > { %1247 = vmatprep.subr.mxu0 %v3074_v45  ;;  %1037 = vmatmul.mubr.f32.vlgmr.msra.gmra.mxu0 %v3479_v56  ;;  %v1176_v28 = vand.u32 4294901760, %v3485_v6  ;;  %v1182_v0 = vand.u32 4294901760, %v3488_v5  ;;  %v3972_v45 = vand.u32 4294901760, %v3256_v32 }
 0x128   : > { %1250 = vmatpush1.msra.mxu0 %v3077_v46  ;;  %1042 = vmatprep.mubr.f32.mxu0 %v2790_v2  ;;  %v3973_v46 = vand.u32 4294901760, %v3297_v33 }
 0x129   : > { %1253 = vmatprep.subr.mxu0 %v3127_v23  ;;  %v1177_v12 = vsub.f32 %v3485_v6, %v1176_v28  ;;  %v1183_v37 = vsub.f32 %v3488_v5, %v1182_v0  ;;  %v3976_v23 = vand.u32 4294901760, %v3344_v58 }
 0x12a   : > { %1256 = vmatpush1.msra.mxu0 %v3130_v24  ;;  %v3977_v24 = vand.u32 4294901760, %v3385_v17 }
 0x12b   : > { %1259 = vmatprep.subr.mxu0 %v3171_v3  ;;  %v1178_v55 = vand.u32 4294901760, %v1177_v12  ;;  %v1184_v44 = vand.u32 4294901760, %v1183_v37  ;;  %1048 = vmatmul.mubr.f32.gmra.mxu0 %v3495_v1  ;;  %v931_v3 = vld [vmem:[#allocation2 + $0xa0] sm:$0xff] }
 0x12c   : > { %1262 = vmatpush1.msra.mxu0 %v3174_v4  ;;  %1337 = vmatprep.mubr.f32.mxu0 %v2790_v2 }
 0x12d   : > { %1179 = vmatprep.subr.mxu1 %v1178_v55  ;;  %1265 = vmatprep.subr.mxu0 %v3209_v39 }
 0x12e   : > { %1185 = vmatpush1.msra.mxu1 %v1184_v44  ;;  %1268 = vmatpush1.msra.mxu0 %v3212_v42  ;;  %v925_v42 = vld [vmem:[#allocation2 + $0x70] sm:$0xff] }
 0x12f   : > { %1220 = vmatmul.mubr.f32.vlgmr.msra.gmra.mxu1 %v3424_v8  ;;  %1271 = vmatprep.subr.mxu0 %v3253_v31  ;;  %v3642_v31 = vand.u32 4294901760, %v925_v42 }
 0x130   : > { %1367 = vmatprep.subr.mxu1 %v3064_v40  ;;  %1274 = vmatpush1.msra.mxu0 %v3256_v32 }
 0x131   : > { %1369 = vmatpush1.msra.mxu1 %v3066_v41  ;;  %1277 = vmatprep.subr.mxu0 %v3297_v33 }
 0x132   : > { %1371 = vmatprep.subr.mxu1 %v3121_v19  ;;  %1280 = vmatpush1.msra.mxu0 %v3300_v34 }
 0x133   : > { %1373 = vmatpush1.msra.mxu1 %v3123_v20  ;;  %1283 = vmatprep.subr.mxu0 %v3341_v57 }
 0x134   : > { %1375 = vmatprep.subr.mxu1 %v3165_v61  ;;  %1286 = vmatpush1.msra.mxu0 %v3344_v58 }
 0x135   : > { %1377 = vmatpush1.msra.mxu1 %v3167_v62  ;;  %1289 = vmatprep.subr.mxu0 %v3385_v17 }
 0x136   : > { %1379 = vmatprep.subr.mxu1 %v3203_v35  ;;  %1292 = vmatpush1.msra.mxu0 %v3388_v18 }
 0x137   : > { %1381 = vmatpush1.msra.mxu1 %v3205_v36  ;;  %1295 = vmatprep.subr.mxu0 %v3444_v7 }
 0x138   : > { %1383 = vmatprep.subr.mxu1 %v3247_v25  ;;  %1298 = vmatpush1.msra.mxu0 %v3447_v11 }
 0x139   : > { %1385 = vmatpush1.msra.mxu1 %v3249_v26  ;;  %1301 = vmatprep.subr.mxu0 %v3485_v6 }
 0x13a   : > { %1387 = vmatprep.subr.mxu1 %v3291_v21  ;;  %1304 = vmatpush1.msra.mxu0 %v3488_v5 }
 0x13b   : > { %1389 = vmatpush1.msra.mxu1 %v3293_v22  ;;  %1225 = vmatprep.mubr.f32.mxu1 %v2790_v2 }
 0x13c   : > { %1340 = vmatmul.mubr.f32.vlgmr.msra.gmra.mxu0 %v3438_v59  ;;  %1391 = vmatprep.subr.mxu1 %v3335_v47 }
 0x13d   : > { %1472 = vmatprep.subr.mxu0 %v1068_v53  ;;  %1227 = vmatmul.mubr.f32.gmra.mxu1 %v3440_v63  ;;  %v3974_v53 = vand.u32 4294901760, %v3300_v34 }
 0x13e   : > { %1393 = vmatpush1.msra.mxu1 %v3337_v48  ;;  %1476 = vmatpush1.msra.mxu0 %v1074_v54  ;;  %v940_v54 = vld [vmem:[#allocation2 + $0xe8] sm:$0xff] }
 0x13f   : > { %1395 = vmatprep.subr.mxu1 %v3379_v13  ;;  %1480 = vmatprep.subr.mxu0 %v1080_v29 }
 0x140   : > { %1345 = vmatprep.mubr.f32.mxu0 %v2790_v2  ;;  %1397 = vmatpush1.msra.mxu1 %v3381_v14 }
 0x141   : > { %1484 = vmatpush1.msra.mxu0 %v1086_v30  ;;  %1399 = vmatprep.subr.mxu1 %v3431_v38  ;;  %v934_v30 = vld [vmem:[#allocation2 + $0xb8] sm:$0xff] }
 0x142   : > { %1348 = vmatmul.mubr.f32.gmra.mxu0 %v3462_v27  ;;  %1488 = vmatprep.subr.mxu0 %v1092_v9  ;;  %v3611_v9 = vand.u32 4294901760, %v934_v30 }
 0x143   : > { %1401 = vmatpush1.msra.mxu1 %v3433_v60  ;;  %1492 = vmatpush1.msra.mxu0 %v1098_v10  ;;  %v928_v10 = vld [vmem:[#allocation2 + $0x88] sm:$0xff] }
 0x144   : > { %1403 = vmatprep.subr.mxu1 %v3475_v52  ;;  %1496 = vmatprep.subr.mxu0 %v1104_v49  ;;  %v3630_v49 = vand.u32 4294901760, %v928_v10 }
 0x145   : > { %1405 = vmatpush1.msra.mxu1 %v3477_v51  ;;  %1438 = vmatprep.mubr.f32.mxu1 %v2790_v2 }
 0x146   : > { %1500 = vmatpush1.msra.mxu0 %v1110_v50  ;;  %1442 = vmatmul.mubr.f32.vlgmr.msra.gmra.mxu1 %v3459_v16  ;;  %v3633_v50 = vsub.f32 %v934_v30, %v3611_v9  ;;  %v3659_v33 = vsub.f32 %v928_v10, %v3630_v49 }
 0x147   : > { %1504 = vmatprep.subr.mxu0 %v1116_v43  ;;  %1609 = vmatprep.subr.mxu1 %v3064_v40  ;;  %v3975_v40 = vand.u32 4294901760, %v3341_v57  ;;  %v3671_v57 = vsub.f32 %v925_v42, %v3642_v31 }
 0x148   : > { %1508 = vmatpush1.msra.mxu0 %v3972_v45  ;;  %1611 = vmatpush1.msra.mxu1 %v3066_v41  ;;  %v937_v41 = vld [vmem:[#allocation2 + $0xd0] sm:$0xff] }
 0x149   : > { %1512 = vmatprep.subr.mxu0 %v3973_v46  ;;  %1613 = vmatprep.subr.mxu1 %v3121_v19  ;;  %v3589_v19 = vand.u32 4294901760, %v940_v54  ;;  %v3597_v29 = vand.u32 4294901760, %v937_v41 }
 0x14a   : > { %1447 = vmatprep.mubr.f32.mxu1 %v2790_v2  ;;  %1516 = vmatpush1.msra.mxu0 %v3974_v53 }
 0x14b   : > { %1615 = vmatpush1.msra.mxu1 %v3123_v20  ;;  %1520 = vmatprep.subr.mxu0 %v3975_v40  ;;  %v3978_v20 = vand.u32 4294901760, %v3388_v18  ;;  %v3606_v4 = vsub.f32 %v940_v54, %v3589_v19 }
 0x14c   : > { %1451 = vmatmul.mubr.f32.gmra.mxu1 %v3473_v15  ;;  %1617 = vmatprep.subr.mxu1 %v3165_v61  ;;  %v3979_v61 = vand.u32 4294901760, %v3444_v7 }
 0x14d   : > { %1524 = vmatpush1.msra.mxu0 %v3976_v23  ;;  %1619 = vmatpush1.msra.mxu1 %v3167_v62  ;;  %v3980_v62 = vand.u32 4294901760, %v3447_v11  ;;  %v3626_v39 = vand.u32 4294901760, %v3606_v4 }
 0x14e   : > { %1528 = vmatprep.subr.mxu0 %v3977_v24  ;;  %1621 = vmatprep.subr.mxu1 %v3203_v35  ;;  %v3617_v35 = vsub.f32 %v937_v41, %v3597_v29 }
 0x14f   : > { %1532 = vmatpush1.msra.mxu0 %v3978_v20  ;;  %1623 = vmatpush1.msra.mxu1 %v3205_v36  ;;  %v3621_v36 = vand.u32 4294901760, %v931_v3  ;;  %v1806_v43 = vsub.f32 %v3606_v4, %v3626_v39 }
 0x150   : > { %1536 = vmatprep.subr.mxu0 %v3979_v61  ;;  %1625 = vmatprep.subr.mxu1 %v3247_v25  ;;  %v3638_v25 = vand.u32 4294901760, %v3617_v35 }
 0x151   : > { %1540 = vmatpush1.msra.mxu0 %v3980_v62  ;;  %1627 = vmatpush1.msra.mxu1 %v3249_v26  ;;  %v922_v26 = vld [vmem:[#allocation2 + $0x58] sm:$0xff]  ;;  %v3645_v32 = vsub.f32 %v931_v3, %v3621_v36  ;;  %v1807_v58 = vand.u32 4294901760, %v1806_v43 }
 0x152   : > { %1544 = vmatprep.subr.mxu0 %v1176_v28  ;;  %1629 = vmatprep.subr.mxu1 %v3291_v21  ;;  %v3653_v44 = vand.u32 4294901760, %v922_v26  ;;  %v3656_v21 = vand.u32 4294901760, %v3633_v50  ;;  %v1813_v34 = vsub.f32 %v3617_v35, %v3638_v25 }
 0x153   : > { %1548 = vmatpush1.msra.mxu0 %v1182_v0  ;;  %1581 = vmatprep.mubr.f32.mxu0 %v2790_v2 }
 0x154   : > { %1631 = vmatpush1.msra.mxu1 %v3293_v22  ;;  %1583 = vmatmul.mubr.f32.vlgmr.msra.gmra.mxu0 %v3424_v8  ;;  %v919_v22 = vld [vmem:[#allocation2 + $0x40] sm:$0xff]  ;;  %v3685_v17 = vsub.f32 %v922_v26, %v3653_v44 }
 0x155   : > { %1633 = vmatprep.subr.mxu1 %v3335_v47  ;;  %2521 = vmatprep.subr.mxu0 %v3589_v19  ;;  %v3668_v47 = vand.u32 4294901760, %v3645_v32  ;;  %v3675_v5 = vand.u32 4294901760, %v919_v22 }
 0x156   : > { %1635 = vmatpush1.msra.mxu1 %v3337_v48  ;;  %2522 = vmatpush3.msra.mxu0 %v3589_v19  ;;  %v916_v48 = vld [vmem:[#allocation2 + $0x28] sm:$0xff]  ;;  %v3707_v0 = vand.u32 4294901760, %v3685_v17 }
 0x157   : > { %1637 = vmatprep.subr.mxu1 %v3379_v13  ;;  %2523 = vmatprep.subr.mxu0 %v3597_v29  ;;  %v3682_v13 = vand.u32 4294901760, %v3659_v33  ;;  %v3688_v18 = vand.u32 4294901760, %v916_v48  ;;  %v3700_v11 = vsub.f32 %v919_v22, %v3675_v5 }
 0x158   : > { %1588 = vmatprep.mubr.f32.mxu0 %v2790_v2  ;;  %1639 = vmatpush1.msra.mxu1 %v3381_v14  ;;  %v913_v14 = vld [vmem:[#allocation2 + $0x10] sm:$0xff]  ;;  %v1848_v53 = vsub.f32 %v3685_v17, %v3707_v0 }
 0x159   : > { %2524 = vmatpush3.msra.mxu0 %v3597_v29  ;;  %1641 = vmatprep.subr.mxu1 %v3431_v38  ;;  %v1827_v38 = vsub.f32 %v3645_v32, %v3668_v47  ;;  %v3697_v7 = vand.u32 4294901760, %v913_v14  ;;  %v1834_v28 = vsub.f32 %v3659_v33, %v3682_v13  ;;  %v3711_v12 = vsub.f32 %v916_v48, %v3688_v18 }
 0x15a   : > { %1590 = vmatmul.mubr.f32.gmra.mxu0 %v3440_v63  ;;  %2525 = vmatprep.subr.mxu0 %v3611_v9  ;;  %v3718_v55 = vand.u32 4294901760, %v3700_v11  ;;  %v1849_v24 = vand.u32 4294901760, %v1848_v53 }
 0x15b   : > { %1643 = vmatpush1.msra.mxu1 %v3433_v60  ;;  %2526 = vmatpush3.msra.mxu0 %v3611_v9  ;;  %v3694_v60 = vand.u32 4294901760, %v3671_v57  ;;  %v1828_v37 = vand.u32 4294901760, %v1827_v38  ;;  %v3721_v45 = vsub.f32 %v913_v14, %v3697_v7  ;;  %v1835_v46 = vand.u32 4294901760, %v1834_v28 }
 0x15c   : > { %1645 = vmatprep.subr.mxu1 %v3475_v52  ;;  %2527 = vmatprep.subr.mxu0 %v3621_v36  ;;  %v1820_v52 = vsub.f32 %v3633_v50, %v3656_v21  ;;  %v3728_v54 = vand.u32 4294901760, %v3711_v12  ;;  %v1855_v41 = vsub.f32 %v3700_v11, %v3718_v55 }
 0x15d   : > { %1647 = vmatpush1.msra.mxu1 %v3477_v51  ;;  %1680 = vmatprep.mubr.f32.mxu1 %v2790_v2  ;;  %v1814_v51 = vand.u32 4294901760, %v1813_v34  ;;  %v3735_v23 = vand.u32 4294901760, %v3721_v45 }
 0x15e   : > { %2528 = vmatpush3.msra.mxu0 %v3621_v36  ;;  %1682 = vmatmul.mubr.f32.vlgmr.msra.gmra.mxu1 %v3424_v8  ;;  %v1821_v6 = vand.u32 4294901760, %v1820_v52  ;;  %v1862_v20 = vsub.f32 %v3711_v12, %v3728_v54  ;;  %v1856_v30 = vand.u32 4294901760, %v1855_v41 }
 0x15f   : > { %2529 = vmatprep.subr.mxu0 %v3630_v49  ;;  %2544 = vmatprep.subr.mxu1 %v1807_v58  ;;  %v1869_v61 = vsub.f32 %v3721_v45, %v3735_v23 }
 0x160   : > { %2530 = vmatpush3.msra.mxu0 %v3630_v49  ;;  %2545 = vmatpush3.msra.mxu1 %v1807_v58  ;;  %v1863_v62 = vand.u32 4294901760, %v1862_v20 }
 0x161   : > { %2531 = vmatprep.subr.mxu0 %v3642_v31  ;;  %2546 = vmatprep.subr.mxu1 %v1814_v51 }
 0x162   : > { %1687 = vmatprep.mubr.f32.mxu1 %v2790_v2  ;;  %2532 = vmatpush3.msra.mxu0 %v3642_v31  ;;  %v1841_v2 = vsub.f32 %v3671_v57, %v3694_v60 }
 0x163   : > { %2547 = vmatpush3.msra.mxu1 %v1814_v51  ;;  %2533 = vmatprep.subr.mxu0 %v3653_v44 }
 0x164   : > { %1689 = vmatmul.mubr.f32.gmra.mxu1 %v3440_v63  ;;  %2548 = vmatprep.subr.mxu1 %v1821_v6  ;;  %v1842_v40 = vand.u32 4294901760, %v1841_v2 }
 0x165   : > { %2534 = vmatpush3.msra.mxu0 %v3653_v44  ;;  %2549 = vmatpush3.msra.mxu1 %v1821_v6 }
 0x166   : > { %2535 = vmatprep.subr.mxu0 %v3675_v5  ;;  %2550 = vmatprep.subr.mxu1 %v1828_v37 }
 0x167   : > { %2536 = vmatpush3.msra.mxu0 %v3675_v5  ;;  %2551 = vmatpush3.msra.mxu1 %v1828_v37 }
 0x168   : > { %2537 = vmatprep.subr.mxu0 %v3688_v18  ;;  %2552 = vmatprep.subr.mxu1 %v1835_v46 }
 0x169   : > { %2538 = vmatpush3.msra.mxu0 %v3688_v18  ;;  %2553 = vmatpush3.msra.mxu1 %v1835_v46 }
 0x16a   : > { %2539 = vmatprep.subr.mxu0 %v3697_v7  ;;  %2554 = vmatprep.subr.mxu1 %v1842_v40 }
 0x16b   : > { %2540 = vmatpush3.msra.mxu0 %v3697_v7  ;;  %2555 = vmatpush3.msra.mxu1 %v1842_v40 }
 0x16c   : > { %2541 = vmatprep.mubr.f32.mxu0 %v3479_v56  ;;  %2556 = vmatprep.subr.mxu1 %v1849_v24  ;;  %v1870_v56 = vand.u32 4294901760, %v1869_v61 }
 0x16d   : > { %2567 = vmatprep.subr.mxu0 %v3606_v4  ;;  %2542 = vmatmul.mubr.f32.vlgmr.msra.gmra.mxu0 %v3495_v1 }
 0x16e   : > { %2557 = vmatpush3.msra.mxu1 %v1849_v24  ;;  %2568 = vmatpush3.msra.mxu0 %v3606_v4 }
 0x16f   : > { %2558 = vmatprep.subr.mxu1 %v1856_v30  ;;  %2569 = vmatprep.subr.mxu0 %v3617_v35 }
 0x170   : > { %2559 = vmatpush3.msra.mxu1 %v1856_v30  ;;  %2570 = vmatpush3.msra.mxu0 %v3617_v35 }
 0x171   : > { %2560 = vmatprep.subr.mxu1 %v1863_v62  ;;  %2571 = vmatprep.subr.mxu0 %v3633_v50 }
 0x172   : > { %2561 = vmatpush3.msra.mxu1 %v1863_v62  ;;  %2572 = vmatpush3.msra.mxu0 %v3633_v50 }
 0x173   : > { %2562 = vmatprep.subr.mxu1 %v1870_v56  ;;  %2573 = vmatprep.subr.mxu0 %v3645_v32 }
 0x174   : > { %2563 = vmatpush3.msra.mxu1 %v1870_v56  ;;  %2564 = vmatprep.mubr.f32.mxu1 %v3424_v8 }
 0x175   : > { %2574 = vmatpush3.msra.mxu0 %v3645_v32  ;;  %2565 = vmatmul.mubr.f32.vlgmr.msra.gmra.mxu1 %v3440_v63 }
 0x176   : > { %2575 = vmatprep.subr.mxu0 %v3659_v33  ;;  %2590 = vmatprep.subr.mxu1 %v3589_v19 }
 0x177   : > { %2576 = vmatpush3.msra.mxu0 %v3659_v33  ;;  %2591 = vmatpush3.msra.mxu1 %v3589_v19 }
 0x178   : > { %2577 = vmatprep.subr.mxu0 %v3671_v57  ;;  %2592 = vmatprep.subr.mxu1 %v3597_v29 }
 0x179   : > { %2578 = vmatpush3.msra.mxu0 %v3671_v57  ;;  %2593 = vmatpush3.msra.mxu1 %v3597_v29 }
 0x17a   : > { %2579 = vmatprep.subr.mxu0 %v3685_v17  ;;  %2594 = vmatprep.subr.mxu1 %v3611_v9 }
 0x17b   : > { %2580 = vmatpush3.msra.mxu0 %v3685_v17  ;;  %2595 = vmatpush3.msra.mxu1 %v3611_v9 }
 0x17c   : > { %2581 = vmatprep.subr.mxu0 %v3700_v11  ;;  %2596 = vmatprep.subr.mxu1 %v3621_v36 }
 0x17d   : > { %2582 = vmatpush3.msra.mxu0 %v3700_v11  ;;  %2597 = vmatpush3.msra.mxu1 %v3621_v36 }
 0x17e   : > { %2583 = vmatprep.subr.mxu0 %v3711_v12  ;;  %2598 = vmatprep.subr.mxu1 %v3630_v49 }
 0x17f   : > { %2584 = vmatpush3.msra.mxu0 %v3711_v12  ;;  %2599 = vmatpush3.msra.mxu1 %v3630_v49 }
 0x180   : > { %2585 = vmatprep.subr.mxu0 %v3721_v45  ;;  %2600 = vmatprep.subr.mxu1 %v3642_v31 }
 0x181   : > { %2586 = vmatpush3.msra.mxu0 %v3721_v45  ;;  %2587 = vmatprep.mubr.f32.mxu0 %v3438_v59 }
 0x182   : > { %2601 = vmatpush3.msra.mxu1 %v3642_v31  ;;  %2588 = vmatmul.mubr.f32.vlgmr.msra.gmra.mxu0 %v3462_v27 }
 0x183   : > { %2602 = vmatprep.subr.mxu1 %v3653_v44  ;;  %2613 = vmatprep.subr.mxu0 %v3626_v39 }
 0x184   : > { %2603 = vmatpush3.msra.mxu1 %v3653_v44  ;;  %2614 = vmatpush3.msra.mxu0 %v3626_v39 }
 0x185   : > { %2604 = vmatprep.subr.mxu1 %v3675_v5  ;;  %2615 = vmatprep.subr.mxu0 %v3638_v25 }
 0x186   : > { %2605 = vmatpush3.msra.mxu1 %v3675_v5  ;;  %2616 = vmatpush3.msra.mxu0 %v3638_v25 }
 0x187   : > { %2606 = vmatprep.subr.mxu1 %v3688_v18  ;;  %2617 = vmatprep.subr.mxu0 %v3656_v21 }
 0x188   : > { %2607 = vmatpush3.msra.mxu1 %v3688_v18  ;;  %2618 = vmatpush3.msra.mxu0 %v3656_v21 }
 0x189   : > { %2608 = vmatprep.subr.mxu1 %v3697_v7  ;;  %2619 = vmatprep.subr.mxu0 %v3668_v47 }
 0x18a   : > { %2609 = vmatpush3.msra.mxu1 %v3697_v7  ;;  %2610 = vmatprep.mubr.f32.mxu1 %v3459_v16 }
 0x18b   : > { %2620 = vmatpush3.msra.mxu0 %v3668_v47  ;;  %2611 = vmatmul.mubr.f32.vlgmr.msra.gmra.mxu1 %v3473_v15 }
 0x18c   : > { %2621 = vmatprep.subr.mxu0 %v3682_v13  ;;  %2636 = vmatprep.subr.mxu1 %v3589_v19 }
 0x18d   : > { %2622 = vmatpush3.msra.mxu0 %v3682_v13  ;;  %2637 = vmatpush3.msra.mxu1 %v3589_v19 }
 0x18e   : > { %2623 = vmatprep.subr.mxu0 %v3694_v60  ;;  %2638 = vmatprep.subr.mxu1 %v3597_v29 }
 0x18f   : > { %2624 = vmatpush3.msra.mxu0 %v3694_v60  ;;  %2639 = vmatpush3.msra.mxu1 %v3597_v29 }
 0x190   : > { %2625 = vmatprep.subr.mxu0 %v3707_v0  ;;  %2640 = vmatprep.subr.mxu1 %v3611_v9 }
 0x191   : > { %2626 = vmatpush3.msra.mxu0 %v3707_v0  ;;  %2641 = vmatpush3.msra.mxu1 %v3611_v9 }
 0x192   : > { %2627 = vmatprep.subr.mxu0 %v3718_v55  ;;  %2642 = vmatprep.subr.mxu1 %v3621_v36 }
 0x193   : > { %2628 = vmatpush3.msra.mxu0 %v3718_v55  ;;  %2643 = vmatpush3.msra.mxu1 %v3621_v36 }
 0x194   : > { %2629 = vmatprep.subr.mxu0 %v3728_v54  ;;  %2644 = vmatprep.subr.mxu1 %v3630_v49 }
 0x195   : > { %2630 = vmatpush3.msra.mxu0 %v3728_v54  ;;  %2645 = vmatpush3.msra.mxu1 %v3630_v49 }
 0x196   : > { %2631 = vmatprep.subr.mxu0 %v3735_v23  ;;  %2646 = vmatprep.subr.mxu1 %v3642_v31 }
 0x197   : > { %2632 = vmatpush3.msra.mxu0 %v3735_v23  ;;  %2633 = vmatprep.mubr.f32.mxu0 %v3424_v8 }
 0x198   : > { %2647 = vmatpush3.msra.mxu1 %v3642_v31  ;;  %2634 = vmatmul.mubr.f32.vlgmr.msra.gmra.mxu0 %v3440_v63 }
 0x199   : > { %2648 = vmatprep.subr.mxu1 %v3653_v44  ;;  %2656 = vmatprep.mubr.f32.mxu1 %v3424_v8 }
 0x19a   : > { %2649 = vmatpush3.msra.mxu1 %v3653_v44 }
 0x19b   : > { %2650 = vmatprep.subr.mxu1 %v3675_v5 }
 0x19c   : > { %2651 = vmatpush3.msra.mxu1 %v3675_v5 }
 0x19d   : > { %2652 = vmatprep.subr.mxu1 %v3688_v18 }
 0x19e   : > { %2653 = vmatpush3.msra.mxu1 %v3688_v18 }
 0x19f   : > { %2654 = vmatprep.subr.mxu1 %v3697_v7 }
 0x1a0   : > { %2655 = vmatpush3.msra.mxu1 %v3697_v7 }
 0x1a1   : > { %2657 = vmatmul.mubr.f32.vlgmr.msra.gmra.mxu1 %v3440_v63 }
 0x1e7   : > { %v1038_v59 = vpop.f32.mrf.mxu0 }
 0x1e9   : > { %v1040_v16 = vpop.f32.mrf.mxu0 }
 0x1eb   : > { %v1049_v27 = vpop.f32.mrf.mxu0 }
 0x1ed   : > { %v1051_v15 = vpop.f32.mrf.mxu0 }
 0x1ef   : > { %v1221_v8 = vpop.f32.mrf.mxu1 }
 0x1f0   : > { %v1222_v42 = vadd.f32 %v1221_v8, %v1038_v59 }
 0x1f1   : > { %v1223_v1 = vpop.f32.mrf.mxu1 }
 0x1f2   : > { %v1224_v63 = vadd.f32 %v1223_v1, %v1040_v16 }
 0x1fc   : > { %v1341_v19 = vpop.f32.mrf.mxu0 }
 0x1fd   : > { %v1228_v29 = vpop.f32.mrf.mxu1  ;;  %v1342_v50 = vadd.f32 %v1341_v19, %v1222_v42 }
 0x1fe   : > { %v1343_v3 = vpop.f32.mrf.mxu0  ;;  %v1229_v26 = vadd.f32 %v1228_v29, %v1049_v27 }
 0x1ff   : > { %v1230_v4 = vpop.f32.mrf.mxu1  ;;  %v1344_v31 = vadd.f32 %v1343_v3, %v1224_v63 }
 0x200   : > { %v1231_v44 = vadd.f32 %v1230_v4, %v1051_v15 }
 0x202   : > { %v1349_v9 = vpop.f32.mrf.mxu0 }
 0x203   : > { %v1350_v47 = vadd.f32 %v1349_v9, %v1229_v26 }
 0x204   : > { %v1351_v35 = vpop.f32.mrf.mxu0 }
 0x205   : > { %v1352_v5 = vadd.f32 %v1351_v35, %v1231_v44 }
 0x206   : > { %v1443_v10 = vpop.f32.mrf.mxu1 }
 0x207   : > { %v1444_v32 = vadd.f32 %v1443_v10, %v1342_v50 }
 0x208   : > { %v1445_v36 = vpop.f32.mrf.mxu1 }
 0x209   : > { %v1446_v21 = vadd.f32 %v1445_v36, %v1344_v31 }
 0x20c   : > { %v1452_v49 = vpop.f32.mrf.mxu1 }
 0x20d   : > { %v1453_v52 = vadd.f32 %v1452_v49, %v1350_v47 }
 0x20e   : > { %v1454_v43 = vpop.f32.mrf.mxu1 }
 0x20f   : > { %v1455_v51 = vadd.f32 %v1454_v43, %v1352_v5 }
 0x214   : > { %v1584_v39 = vpop.f32.mrf.mxu0 }
 0x215   : > { %v1585_v22 = vadd.f32 %v1584_v39, %v1444_v32 }
 0x216   : > { %v1586_v25 = vpop.f32.mrf.mxu0 }
 0x217   : > { %v1587_v48 = vadd.f32 %v1586_v25, %v1446_v21 }
 0x21a   : > { %v1591_v33 = vpop.f32.mrf.mxu0 }
 0x21b   : > { %v1592_v18 = vadd.f32 %v1591_v33, %v1453_v52 }
 0x21c   : > { %v1593_v17 = vpop.f32.mrf.mxu0 }
 0x21d   : > { %v1594_v7 = vadd.f32 %v1593_v17, %v1455_v51 }
 0x21e   : > { %v1683_v34 = vpop.f32.mrf.mxu1 }
 0x21f   : > { %v1684_v57 = vadd.f32 %v1683_v34, %v1585_v22 }
 0x220   : > { %v1685_v58 = vpop.f32.mrf.mxu1 }
 0x221   : > { %v2301_v13 = vmax.f32 %v1684_v57, 0.0  ;;  %v1686_v14 = vadd.f32 %v1685_v58, %v1587_v48 }
 0x223   : > { %2307 = vst [vmem:[%s3838_s8] sm:$0xff] %v2301_v13  ;;  %v2302_v38 = vmax.f32 %v1686_v14, 0.0 }
 0x224   : > { %v1690_v60 = vpop.f32.mrf.mxu1 }
 0x225   : > { %2308 = vst [vmem:[%s3838_s8 + $0x8] sm:$0xff] %v2302_v38  ;;  %v1691_v11 = vadd.f32 %v1690_v60, %v1592_v18 }
 0x226   : > { %v1692_v6 = vpop.f32.mrf.mxu1 }
 0x227   : > { %v2304_v28 = vmax.f32 %v1691_v11, 0.0  ;;  %v1693_v0 = vadd.f32 %v1692_v6, %v1594_v7 }
 0x229   : > { %2310 = vst [vmem:[%s3838_s8 + $0x18] sm:$0xff] %v2304_v28  ;;  %v2305_v12 = vmax.f32 %v1693_v0, 0.0 }
 0x22b   : > { %2311 = vst [vmem:[%s3838_s8 + $0x20] sm:$0xff] %v2305_v12 }
 0x22d   : > { %v2543_v37 = vpop.f32.mrf.mxu0 }
 0x22f   : > { %v1776_v2 = vpop.f32.mrf.mxu0 }
 0x235   : > { %v2566_v55 = vpop.f32.mrf.mxu1 }
 0x236   : > { %v1914_v40 = vadd.f32 %v2566_v55, %v2543_v37 }
 0x237   : > { %v1907_v46 = vpop.f32.mrf.mxu1 }
 0x238   : > { %v1908_v23 = vadd.f32 %v1907_v46, %v1776_v2 }
 0x242   : > { %v2589_v45 = vpop.f32.mrf.mxu0 }
 0x243   : > { %v2013_v24 = vadd.f32 %v2589_v45, %v1914_v40 }
 0x244   : > { %v2005_v53 = vpop.f32.mrf.mxu0 }
 0x245   : > { %v2006_v30 = vadd.f32 %v2005_v53, %v1908_v23 }
 0x24b   : > { %v2612_v54 = vpop.f32.mrf.mxu1 }
 0x24c   : > { %v2104_v61 = vadd.f32 %v2612_v54, %v2013_v24 }
 0x24d   : > { %v2095_v20 = vpop.f32.mrf.mxu1 }
 0x24e   : > { %v2096_v56 = vadd.f32 %v2095_v20, %v2006_v30 }
 0x258   : > { %v2635_v41 = vpop.f32.mrf.mxu0 }
 0x259   : > { %v2211_v59 = vadd.f32 %v2635_v41, %v2104_v61 }
 0x25a   : > { %v2204_v62 = vpop.f32.mrf.mxu0 }
 0x25b   : > { %v2205_v27 = vadd.f32 %v2204_v62, %v2096_v56 }
 0x261   : > { %v2658_v16 = vpop.f32.mrf.mxu1 }
 0x262   : > { %v2298_v8 = vadd.f32 %v2658_v16, %v2211_v59 }
 0x263   : > { %v2291_v15 = vpop.f32.mrf.mxu1 }
 0x264   : > { %v2306_v1 = vmax.f32 %v2298_v8, 0.0  ;;  %v2292_v19 = vadd.f32 %v2291_v15, %v2205_v27 }
 0x266   : > { %2312 = vst [vmem:[%s3838_s8 + $0x28] sm:$0xff] %v2306_v1  ;;  %v2303_v29 = vmax.f32 %v2292_v19, 0.0 }
 0x268   : > { %2309 = vst [vmem:[%s3838_s8 + $0x10] sm:$0xff] %v2303_v29 }
 0x269   : > { %2741 = shalt.err (!%p2738_p3)
}
 0x26a   : > { %s2742_s5 = scalar_lea.hbm %s3851_s23, 768  ;;  %s2746_s25 = scalar_lea.hbm %s3899_s2, 1536 }
 0x26b   : > { %p2743_p4 = scmp.ne.s32.totalorder %s3851_s23, %s2742_s5  ;;  %p2747_p9 = scmp.lt.s32.totalorder %s3851_s23, %s3899_s2 }
 0x26c   : > { %p2748_p10 = scmp.lt.s32.totalorder %s2746_s25, %s2742_s5 }
 0x26d   : > { %p2744_p7 = pnand %p2743_p4, %p2872_p5 }
 0x26e   : > { %p2749_p11 = por %p2748_p10, %p2747_p9 }
 0x26f   : > { %p2745_p8 = pneg %p2744_p7 }
 0x271   : > { %p2750_p12 = pnand %p2749_p11, %p2745_p8 }
 0x273   : > { %2753 = shalt.err (!%p2750_p12)
}
 0x274   : > { %s2817_s30 = smov 384   ;;  %s2818_s6 = smov 24  }
 0x275   : > { %2661 = dma.vmem_to_hbm [thread:$0]  (%p2872_p5), %s3846_s16, 768, %s3851_s23, %s3857_s13, %s2817_s30, %s2817_s30, %s2818_s6  }
 0x276 PF: > { %p2667_p13 = scmp.ge.s32.totalorder %s2788_s12, 2  ;;  %s2342_s7 = sand.u32 1, %s2776_s9  }
 0x277   : > { %s2343_s8 = scalar_lea.sflag [#allocation4], %s2342_s7 }
 0x278   : > { %p2664_p0 = pnand %p2667_p13, %p2876_p6 }
 0x27a   : > { %p2665_p1 = pneg %p2664_p0 }
 0x27c   : > { %2771 = dma.done.wait (%p2665_p1), %s2343_s8, 768  }
 0x27d   : > { %2773 = vsyncadd (%p2665_p1), %s2343_s8, 4294966528  ;;  %p12_p2 = scmp.ge.s32.totalorder %s2859_s15, 4   ;;  %s3981_s9 = smov %s2780_s10 }
 0x27e   : > { %s3982_s10 = smov %s2784_s11  ;;  %s3983_s11 = smov %s2870_s18 }
 0x27f   : > { %s3984_s12 = smov %s2859_s15  ;;  %14 = sbr.rel (!%p12_p2) target bundleno = 3 (0x3), region = 140 }
 0x284   :  { %2348 = vsyncpa [#allocation4], 1 }
 0x285   :  { %2350 = vsyncpa [#allocation4 + $0x1], 1 }

</bundles_post_ra>
